<compile_context>
chip_gen: v7x
topology: tpu7x:2x2x1
jax: 0.10.0
libtpu: 0.0.40
codegen_flags: <defaults>
</compile_context>

<pallas_src>
import functools

import jax
import jax.numpy as jnp
from jax.experimental import pallas as pl
from jax.experimental.pallas import tpu as pltpu


# ----------------------------------------------------------------------------
# In-kernel helpers (operate on VMEM-resident values, all shapes static)
# ----------------------------------------------------------------------------
def _im2col_conv(h, w_col, bias, *, K, dil, pad_left, pad_right):
    """Dilated 1-D conv on (T, Cin) as one im2col matmul.

    h:     (T, Cin) activation
    w_col: (K*Cin, Cout) tap-major weights
    bias:  (1, Cout)
    """
    T, C = h.shape
    pieces = []
    if pad_left:
        pieces.append(jnp.zeros((pad_left, C), h.dtype))
    pieces.append(h)
    if pad_right:
        pieces.append(jnp.zeros((pad_right, C), h.dtype))
    hp = jnp.concatenate(pieces, axis=0) if len(pieces) > 1 else h  # (T+pad, C)
    cols = [hp[k * dil:k * dil + T, :] for k in range(K)]           # static slices
    xcol = jnp.concatenate(cols, axis=1) if K > 1 else cols[0]      # (T, K*C)
    return jnp.dot(xcol, w_col, preferred_element_type=jnp.float32) + bias


# ----------------------------------------------------------------------------
# Fused forward kernel (one batch element per grid step)
# ----------------------------------------------------------------------------
def _tcn_fused_kernel(x_ref, iw_ref, ib_ref,
                      w1_ref, b1_ref, w2_ref, b2_ref, rw_ref, rb_ref,
                      lw_ref, lb_ref, ow_ref, ob_ref,
                      o_ref, *, kernel_size, dilations):
    K = kernel_size
    x = x_ref[0].astype(jnp.float32)                       # (T, 1)

    # initial_conv: Conv1d(1, F, K, padding='same')  (odd K -> symmetric pad)
    pl_ = (K - 1) // 2
    h = _im2col_conv(x, iw_ref[...], ib_ref[...],
                     K=K, dil=1, pad_left=pl_, pad_right=(K - 1) - pl_)  # (T, F)

    for i, d in enumerate(dilations):
        # Residual projection to a SINGLE channel (matches the reference:
        # residual_conv has out_channels=1 and the result broadcast-adds over
        # all F output channels).  Done as a cheap channel reduction (XLU).
        residual = jnp.sum(h * rw_ref[i], axis=-1, keepdims=True) + rb_ref[i]  # (T,1)

        pad = (K - 1) * d                                   # CausalConv1d, lookahead=0
        h1 = jnp.maximum(
            _im2col_conv(h, w1_ref[i], b1_ref[i], K=K, dil=d,
                         pad_left=pad, pad_right=0), 0.0)
        # TODO(synk): nn.Dropout(0.1) is identity in eval mode, omitted.
        h2 = jnp.maximum(
            _im2col_conv(h1, w2_ref[i], b2_ref[i], K=K, dil=d,
                         pad_left=pad, pad_right=0), 0.0)
        h = h2 + residual                                   # (T, F)

    # label_layer + ReLU, then output_layer
    y = jnp.maximum(
        jnp.dot(h, lw_ref[...], preferred_element_type=jnp.float32) + lb_ref[...],
        0.0)                                                # (T, hidden)
    o = jnp.dot(y, ow_ref[...], preferred_element_type=jnp.float32) + ob_ref[...]
    o_ref[0] = o.astype(o_ref.dtype)                        # (T, appliances)


def _const_map(ndim):
    zeros = (0,) * ndim

    def imap(b):
        return zeros

    return imap


def _full_spec(arr):
    return pl.BlockSpec(arr.shape, _const_map(arr.ndim))


def tcn_forward(x, params):
    """x: (B, T, 1) -- the PyTorch module's input before its internal permute."""
    B, T, _ = x.shape
    dilations = params["dilations"]
    K = params["kernel_size"]
    A = params["out_b"].shape[-1]

    kern = functools.partial(_tcn_fused_kernel,
                             kernel_size=K, dilations=dilations)

    weight_args = (params["init_w"], params["init_b"],
                   params["w1"], params["b1"],
                   params["w2"], params["b2"],
                   params["res_w"], params["res_b"],
                   params["label_w"], params["label_b"],
                   params["out_w"], params["out_b"])

    in_specs = [pl.BlockSpec((1, T, 1), lambda b: (b, 0, 0))]
    in_specs += [_full_spec(w) for w in weight_args]

    # NOTE: final (B, T, A=8) output is lane-sparse (A < 128); it is a single
    # tiny store per batch element so we keep the natural layout.
    return pl.pallas_call(
        kern,
        out_shape=jax.ShapeDtypeStruct((B, T, A), x.dtype),
        grid=(B,),
        in_specs=in_specs,
        out_specs=pl.BlockSpec((1, T, A), lambda b: (b, 0, 0)),
        compiler_params=pltpu.CompilerParams(
            dimension_semantics=("parallel",)),   # 2 blocks -> both v7x TCs busy
    )(x, *weight_args)


# ----------------------------------------------------------------------------
# Parameter construction (deterministic, synthetic) in kernel-ready layout
# ----------------------------------------------------------------------------
def _weight_norm(v, g):
    # PyTorch weight_norm (dim=0): w = g * v / ||v||, norm over (Cin, K).
    norm = jnp.sqrt(jnp.sum(v * v, axis=(1, 2), keepdims=True))
    return g[:, None, None] * v / norm


def _conv_to_im2col(w_torch):
    # torch Conv1d weight (Cout, Cin, K) -> (K*Cin, Cout), tap-major rows.
    cout, cin, K = w_torch.shape
    return jnp.transpose(w_torch, (2, 1, 0)).reshape(K * cin, cout)


def init_params(key, *, filters=32, kernel_size=3,
                dilation_rate=(2, 4, 8, 16), hidden=1024, appliances=8):
    keys = iter(jax.random.split(key, 64))

    def nrm(shape, scale=0.1):
        return scale * jax.random.normal(next(keys), shape, jnp.float32)

    p = {"kernel_size": kernel_size, "dilations": tuple(dilation_rate)}

    # initial_conv: Conv1d(1, filters, K, padding='same')
    p["init_w"] = _conv_to_im2col(nrm((filters, 1, kernel_size)))   # (K, F)
    p["init_b"] = nrm((filters,)).reshape(1, filters)

    w1, b1, w2, b2, rw, rb = [], [], [], [], [], []
    for _ in dilation_rate:
        v1, g1 = nrm((filters, filters, kernel_size)), 1.0 + nrm((filters,))
        v2, g2 = nrm((filters, filters, kernel_size)), 1.0 + nrm((filters,))
        w1.append(_conv_to_im2col(_weight_norm(v1, g1)))            # (K*F, F)
        b1.append(nrm((filters,)).reshape(1, filters))
        w2.append(_conv_to_im2col(_weight_norm(v2, g2)))
        b2.append(nrm((filters,)).reshape(1, filters))
        # residual_conv: Conv1d(filters, 1, 1) -> weight (1, F, 1) used as a
        # per-channel reduction vector.
        rw.append(nrm((1, filters, 1)).reshape(1, filters))
        rb.append(nrm((1,)).reshape(1, 1))
    p["w1"] = jnp.stack(w1)      # (nb, K*F, F)
    p["b1"] = jnp.stack(b1)      # (nb, 1, F)
    p["w2"] = jnp.stack(w2)
    p["b2"] = jnp.stack(b2)
    p["res_w"] = jnp.stack(rw)   # (nb, 1, F)
    p["res_b"] = jnp.stack(rb)   # (nb, 1, 1)

    # torch Linear weight is (out, in); store as (in, out).
    p["label_w"] = nrm((hidden, filters)).T                         # (F, hidden)
    p["label_b"] = nrm((hidden,)).reshape(1, hidden)
    p["out_w"] = nrm((appliances, hidden)).T                        # (hidden, A)
    p["out_b"] = nrm((appliances,)).reshape(1, appliances)
    return p


if __name__ == "__main__":
    B, T, appliances = 2, 16, 8          # window_size = 16
    key = jax.random.PRNGKey(0)
    kx, kp = jax.random.split(key)
    x = jax.random.normal(kx, (B, T, 1), jnp.float32)
    params = init_params(kp, appliances=appliances)

    out = jax.jit(lambda xx: tcn_forward(xx, params))(x)
    jax.block_until_ready(out)
    assert out.shape == (B, T, appliances), out.shape
    assert bool(jnp.all(jnp.isfinite(out)))
    print("KERNEL_OK")
</pallas_src>

<mosaic_0001>
module attributes {stable_mosaic.version = 11 : i64} {
  func.func @_tcn_fused_kernel(%arg0: i32, %arg1: memref<1x16x1xf32, #tpu.memory_space<vmem>>, %arg2: memref<3x32xf32, #tpu.memory_space<vmem>>, %arg3: memref<1x32xf32, #tpu.memory_space<vmem>>, %arg4: memref<4x96x32xf32, #tpu.memory_space<vmem>>, %arg5: memref<4x1x32xf32, #tpu.memory_space<vmem>>, %arg6: memref<4x96x32xf32, #tpu.memory_space<vmem>>, %arg7: memref<4x1x32xf32, #tpu.memory_space<vmem>>, %arg8: memref<4x1x32xf32, #tpu.memory_space<vmem>>, %arg9: memref<4x1x1xf32, #tpu.memory_space<vmem>>, %arg10: memref<32x1024xf32, #tpu.memory_space<vmem>>, %arg11: memref<1x1024xf32, #tpu.memory_space<vmem>>, %arg12: memref<1024x8xf32, #tpu.memory_space<vmem>>, %arg13: memref<1x8xf32, #tpu.memory_space<vmem>>, %arg14: memref<1x16x8xf32, #tpu.memory_space<vmem>>) attributes {dimension_semantics = [#tpu.dimension_semantics<parallel>], iteration_bounds = array<i64: 2>, scalar_prefetch = 0 : i64, scratch_operands = 0 : i64, tpu.core_type = #tpu.core_type<tc>, window_params = [{transform_indices = @transform_0, window_bounds = array<i64: 1, 16, 1>}, {pipeline_mode = #tpu.pipeline_mode<synchronous>, transform_indices = @transform_1, window_bounds = array<i64: 3, 32>}, {pipeline_mode = #tpu.pipeline_mode<synchronous>, transform_indices = @transform_2, window_bounds = array<i64: 1, 32>}, {pipeline_mode = #tpu.pipeline_mode<synchronous>, transform_indices = @transform_3, window_bounds = array<i64: 4, 96, 32>}, {pipeline_mode = #tpu.pipeline_mode<synchronous>, transform_indices = @transform_4, window_bounds = array<i64: 4, 1, 32>}, {pipeline_mode = #tpu.pipeline_mode<synchronous>, transform_indices = @transform_5, window_bounds = array<i64: 4, 96, 32>}, {pipeline_mode = #tpu.pipeline_mode<synchronous>, transform_indices = @transform_6, window_bounds = array<i64: 4, 1, 32>}, {pipeline_mode = #tpu.pipeline_mode<synchronous>, transform_indices = @transform_7, window_bounds = array<i64: 4, 1, 32>}, {pipeline_mode = #tpu.pipeline_mode<synchronous>, transform_indices = @transform_8, window_bounds = array<i64: 4, 1, 1>}, {pipeline_mode = #tpu.pipeline_mode<synchronous>, transform_indices = @transform_9, window_bounds = array<i64: 32, 1024>}, {pipeline_mode = #tpu.pipeline_mode<synchronous>, transform_indices = @transform_10, window_bounds = array<i64: 1, 1024>}, {pipeline_mode = #tpu.pipeline_mode<synchronous>, transform_indices = @transform_11, window_bounds = array<i64: 1024, 8>}, {pipeline_mode = #tpu.pipeline_mode<synchronous>, transform_indices = @transform_12, window_bounds = array<i64: 1, 8>}, {transform_indices = @transform_13, window_bounds = array<i64: 1, 16, 8>}]} {
    %c0 = arith.constant 0 : index
    %c0_0 = arith.constant 0 : index
    %c0_1 = arith.constant 0 : index
    %0 = vector.load %arg1[%c0, %c0_0, %c0_1] : memref<1x16x1xf32, #tpu.memory_space<vmem>>, vector<1x16x1xf32>
    %1 = vector.shape_cast %0 : vector<1x16x1xf32> to vector<16x1xf32>
    %c0_2 = arith.constant 0 : index
    %c0_3 = arith.constant 0 : index
    %2 = vector.load %arg2[%c0_2, %c0_3] : memref<3x32xf32, #tpu.memory_space<vmem>>, vector<3x32xf32>
    %c0_4 = arith.constant 0 : index
    %c0_5 = arith.constant 0 : index
    %3 = vector.load %arg3[%c0_4, %c0_5] : memref<1x32xf32, #tpu.memory_space<vmem>>, vector<1x32xf32>
    %cst = arith.constant 0.000000e+00 : f32
    %4 = vector.broadcast %cst : f32 to vector<1x1xf32>
    %cst_6 = arith.constant 0.000000e+00 : f32
    %5 = vector.broadcast %cst_6 : f32 to vector<1x1xf32>
    %6 = tpu.concatenate %4, %1, %5 in 0 : vector<1x1xf32>, vector<16x1xf32>, vector<1x1xf32> -> vector<18x1xf32>
    %7 = vector.extract_strided_slice %6 {offsets = [0, 0], sizes = [16, 1], strides = [1, 1]} : vector<18x1xf32> to vector<16x1xf32>
    %8 = vector.extract_strided_slice %6 {offsets = [1, 0], sizes = [16, 1], strides = [1, 1]} : vector<18x1xf32> to vector<16x1xf32>
    %9 = vector.extract_strided_slice %6 {offsets = [2, 0], sizes = [16, 1], strides = [1, 1]} : vector<18x1xf32> to vector<16x1xf32>
    %10 = tpu.concatenate %7, %8, %9 in 1 : vector<16x1xf32>, vector<16x1xf32>, vector<16x1xf32> -> vector<16x3xf32>
    %cst_7 = arith.constant dense<0.000000e+00> : vector<16x32xf32>
    %11 = tpu.matmul %10, %2, %cst_7 {dimension_numbers = #tpu.dot_dimension_numbers<[1], [0], [0], [1], [0, 0, 1, 1], [], []>} : vector<16x3xf32>, vector<3x32xf32>, vector<16x32xf32> -> vector<16x32xf32>
    %12 = vector.broadcast %3 : vector<1x32xf32> to vector<16x32xf32>
    %13 = arith.addf %11, %12 : vector<16x32xf32>
    %c0_8 = arith.constant 0 : index
    %c0_9 = arith.constant 0 : index
    %c0_10 = arith.constant 0 : index
    %14 = vector.load %arg8[%c0_8, %c0_9, %c0_10] : memref<4x1x32xf32, #tpu.memory_space<vmem>>, vector<1x1x32xf32>
    %15 = vector.shape_cast %14 : vector<1x1x32xf32> to vector<1x32xf32>
    %16 = vector.broadcast %15 : vector<1x32xf32> to vector<16x32xf32>
    %17 = arith.mulf %13, %16 : vector<16x32xf32>
    %cst_11 = arith.constant dense<0.000000e+00> : vector<16xf32>
    %18 = vector.multi_reduction <add>, %17, %cst_11 [1] : vector<16x32xf32> to vector<16xf32>
    %19 = vector.shape_cast %18 : vector<16xf32> to vector<16x1xf32>
    %c0_12 = arith.constant 0 : index
    %c0_13 = arith.constant 0 : index
    %c0_14 = arith.constant 0 : index
    %20 = vector.load %arg9[%c0_12, %c0_13, %c0_14] : memref<4x1x1xf32, #tpu.memory_space<vmem>>, vector<1x1x1xf32>
    %21 = vector.shape_cast %20 : vector<1x1x1xf32> to vector<1x1xf32>
    %22 = vector.broadcast %21 : vector<1x1xf32> to vector<16x1xf32>
    %23 = arith.addf %19, %22 : vector<16x1xf32>
    %c0_15 = arith.constant 0 : index
    %c0_16 = arith.constant 0 : index
    %c0_17 = arith.constant 0 : index
    %24 = vector.load %arg4[%c0_15, %c0_16, %c0_17] : memref<4x96x32xf32, #tpu.memory_space<vmem>>, vector<1x96x32xf32>
    %25 = vector.shape_cast %24 : vector<1x96x32xf32> to vector<96x32xf32>
    %c0_18 = arith.constant 0 : index
    %c0_19 = arith.constant 0 : index
    %c0_20 = arith.constant 0 : index
    %26 = vector.load %arg5[%c0_18, %c0_19, %c0_20] : memref<4x1x32xf32, #tpu.memory_space<vmem>>, vector<1x1x32xf32>
    %27 = vector.shape_cast %26 : vector<1x1x32xf32> to vector<1x32xf32>
    %cst_21 = arith.constant 0.000000e+00 : f32
    %28 = vector.broadcast %cst_21 : f32 to vector<4x32xf32>
    %29 = tpu.concatenate %28, %13 in 0 : vector<4x32xf32>, vector<16x32xf32> -> vector<20x32xf32>
    %30 = vector.extract_strided_slice %29 {offsets = [0, 0], sizes = [16, 32], strides = [1, 1]} : vector<20x32xf32> to vector<16x32xf32>
    %31 = vector.extract_strided_slice %29 {offsets = [2, 0], sizes = [16, 32], strides = [1, 1]} : vector<20x32xf32> to vector<16x32xf32>
    %32 = vector.extract_strided_slice %29 {offsets = [4, 0], sizes = [16, 32], strides = [1, 1]} : vector<20x32xf32> to vector<16x32xf32>
    %33 = tpu.concatenate %30, %31, %32 in 1 : vector<16x32xf32>, vector<16x32xf32>, vector<16x32xf32> -> vector<16x96xf32>
    %cst_22 = arith.constant dense<0.000000e+00> : vector<16x32xf32>
    %34 = tpu.matmul %33, %25, %cst_22 {dimension_numbers = #tpu.dot_dimension_numbers<[1], [0], [0], [1], [0, 0, 1, 1], [], []>} : vector<16x96xf32>, vector<96x32xf32>, vector<16x32xf32> -> vector<16x32xf32>
    %35 = vector.broadcast %27 : vector<1x32xf32> to vector<16x32xf32>
    %36 = arith.addf %34, %35 : vector<16x32xf32>
    %cst_23 = arith.constant 0.000000e+00 : f32
    %37 = vector.broadcast %cst_23 : f32 to vector<16x32xf32>
    %38 = arith.maximumf %36, %37 : vector<16x32xf32>
    %c0_24 = arith.constant 0 : index
    %c0_25 = arith.constant 0 : index
    %c0_26 = arith.constant 0 : index
    %39 = vector.load %arg6[%c0_24, %c0_25, %c0_26] : memref<4x96x32xf32, #tpu.memory_space<vmem>>, vector<1x96x32xf32>
    %40 = vector.shape_cast %39 : vector<1x96x32xf32> to vector<96x32xf32>
    %c0_27 = arith.constant 0 : index
    %c0_28 = arith.constant 0 : index
    %c0_29 = arith.constant 0 : index
    %41 = vector.load %arg7[%c0_27, %c0_28, %c0_29] : memref<4x1x32xf32, #tpu.memory_space<vmem>>, vector<1x1x32xf32>
    %42 = vector.shape_cast %41 : vector<1x1x32xf32> to vector<1x32xf32>
    %cst_30 = arith.constant 0.000000e+00 : f32
    %43 = vector.broadcast %cst_30 : f32 to vector<4x32xf32>
    %44 = tpu.concatenate %43, %38 in 0 : vector<4x32xf32>, vector<16x32xf32> -> vector<20x32xf32>
    %45 = vector.extract_strided_slice %44 {offsets = [0, 0], sizes = [16, 32], strides = [1, 1]} : vector<20x32xf32> to vector<16x32xf32>
    %46 = vector.extract_strided_slice %44 {offsets = [2, 0], sizes = [16, 32], strides = [1, 1]} : vector<20x32xf32> to vector<16x32xf32>
    %47 = vector.extract_strided_slice %44 {offsets = [4, 0], sizes = [16, 32], strides = [1, 1]} : vector<20x32xf32> to vector<16x32xf32>
    %48 = tpu.concatenate %45, %46, %47 in 1 : vector<16x32xf32>, vector<16x32xf32>, vector<16x32xf32> -> vector<16x96xf32>
    %cst_31 = arith.constant dense<0.000000e+00> : vector<16x32xf32>
    %49 = tpu.matmul %48, %40, %cst_31 {dimension_numbers = #tpu.dot_dimension_numbers<[1], [0], [0], [1], [0, 0, 1, 1], [], []>} : vector<16x96xf32>, vector<96x32xf32>, vector<16x32xf32> -> vector<16x32xf32>
    %50 = vector.broadcast %42 : vector<1x32xf32> to vector<16x32xf32>
    %51 = arith.addf %49, %50 : vector<16x32xf32>
    %cst_32 = arith.constant 0.000000e+00 : f32
    %52 = vector.broadcast %cst_32 : f32 to vector<16x32xf32>
    %53 = arith.maximumf %51, %52 : vector<16x32xf32>
    %54 = vector.broadcast %23 : vector<16x1xf32> to vector<16x32xf32>
    %55 = arith.addf %53, %54 : vector<16x32xf32>
    %c1 = arith.constant 1 : index
    %c0_33 = arith.constant 0 : index
    %c0_34 = arith.constant 0 : index
    %56 = vector.load %arg8[%c1, %c0_33, %c0_34] : memref<4x1x32xf32, #tpu.memory_space<vmem>>, vector<1x1x32xf32>
    %57 = vector.shape_cast %56 : vector<1x1x32xf32> to vector<1x32xf32>
    %58 = vector.broadcast %57 : vector<1x32xf32> to vector<16x32xf32>
    %59 = arith.mulf %55, %58 : vector<16x32xf32>
    %cst_35 = arith.constant dense<0.000000e+00> : vector<16xf32>
    %60 = vector.multi_reduction <add>, %59, %cst_35 [1] : vector<16x32xf32> to vector<16xf32>
    %61 = vector.shape_cast %60 : vector<16xf32> to vector<16x1xf32>
    %c1_36 = arith.constant 1 : index
    %c0_37 = arith.constant 0 : index
    %c0_38 = arith.constant 0 : index
    %62 = vector.load %arg9[%c1_36, %c0_37, %c0_38] : memref<4x1x1xf32, #tpu.memory_space<vmem>>, vector<1x1x1xf32>
    %63 = vector.shape_cast %62 : vector<1x1x1xf32> to vector<1x1xf32>
    %64 = vector.broadcast %63 : vector<1x1xf32> to vector<16x1xf32>
    %65 = arith.addf %61, %64 : vector<16x1xf32>
    %c1_39 = arith.constant 1 : index
    %c0_40 = arith.constant 0 : index
    %c0_41 = arith.constant 0 : index
    %66 = vector.load %arg4[%c1_39, %c0_40, %c0_41] : memref<4x96x32xf32, #tpu.memory_space<vmem>>, vector<1x96x32xf32>
    %67 = vector.shape_cast %66 : vector<1x96x32xf32> to vector<96x32xf32>
    %c1_42 = arith.constant 1 : index
    %c0_43 = arith.constant 0 : index
    %c0_44 = arith.constant 0 : index
    %68 = vector.load %arg5[%c1_42, %c0_43, %c0_44] : memref<4x1x32xf32, #tpu.memory_space<vmem>>, vector<1x1x32xf32>
    %69 = vector.shape_cast %68 : vector<1x1x32xf32> to vector<1x32xf32>
    %cst_45 = arith.constant 0.000000e+00 : f32
    %70 = vector.broadcast %cst_45 : f32 to vector<8x32xf32>
    %71 = tpu.concatenate %70, %55 in 0 : vector<8x32xf32>, vector<16x32xf32> -> vector<24x32xf32>
    %72 = vector.extract_strided_slice %71 {offsets = [0, 0], sizes = [16, 32], strides = [1, 1]} : vector<24x32xf32> to vector<16x32xf32>
    %73 = vector.extract_strided_slice %71 {offsets = [4, 0], sizes = [16, 32], strides = [1, 1]} : vector<24x32xf32> to vector<16x32xf32>
    %74 = vector.extract_strided_slice %71 {offsets = [8, 0], sizes = [16, 32], strides = [1, 1]} : vector<24x32xf32> to vector<16x32xf32>
    %75 = tpu.concatenate %72, %73, %74 in 1 : vector<16x32xf32>, vector<16x32xf32>, vector<16x32xf32> -> vector<16x96xf32>
    %cst_46 = arith.constant dense<0.000000e+00> : vector<16x32xf32>
    %76 = tpu.matmul %75, %67, %cst_46 {dimension_numbers = #tpu.dot_dimension_numbers<[1], [0], [0], [1], [0, 0, 1, 1], [], []>} : vector<16x96xf32>, vector<96x32xf32>, vector<16x32xf32> -> vector<16x32xf32>
    %77 = vector.broadcast %69 : vector<1x32xf32> to vector<16x32xf32>
    %78 = arith.addf %76, %77 : vector<16x32xf32>
    %cst_47 = arith.constant 0.000000e+00 : f32
    %79 = vector.broadcast %cst_47 : f32 to vector<16x32xf32>
    %80 = arith.maximumf %78, %79 : vector<16x32xf32>
    %c1_48 = arith.constant 1 : index
    %c0_49 = arith.constant 0 : index
    %c0_50 = arith.constant 0 : index
    %81 = vector.load %arg6[%c1_48, %c0_49, %c0_50] : memref<4x96x32xf32, #tpu.memory_space<vmem>>, vector<1x96x32xf32>
    %82 = vector.shape_cast %81 : vector<1x96x32xf32> to vector<96x32xf32>
    %c1_51 = arith.constant 1 : index
    %c0_52 = arith.constant 0 : index
    %c0_53 = arith.constant 0 : index
    %83 = vector.load %arg7[%c1_51, %c0_52, %c0_53] : memref<4x1x32xf32, #tpu.memory_space<vmem>>, vector<1x1x32xf32>
    %84 = vector.shape_cast %83 : vector<1x1x32xf32> to vector<1x32xf32>
    %cst_54 = arith.constant 0.000000e+00 : f32
    %85 = vector.broadcast %cst_54 : f32 to vector<8x32xf32>
    %86 = tpu.concatenate %85, %80 in 0 : vector<8x32xf32>, vector<16x32xf32> -> vector<24x32xf32>
    %87 = vector.extract_strided_slice %86 {offsets = [0, 0], sizes = [16, 32], strides = [1, 1]} : vector<24x32xf32> to vector<16x32xf32>
    %88 = vector.extract_strided_slice %86 {offsets = [4, 0], sizes = [16, 32], strides = [1, 1]} : vector<24x32xf32> to vector<16x32xf32>
    %89 = vector.extract_strided_slice %86 {offsets = [8, 0], sizes = [16, 32], strides = [1, 1]} : vector<24x32xf32> to vector<16x32xf32>
    %90 = tpu.concatenate %87, %88, %89 in 1 : vector<16x32xf32>, vector<16x32xf32>, vector<16x32xf32> -> vector<16x96xf32>
    %cst_55 = arith.constant dense<0.000000e+00> : vector<16x32xf32>
    %91 = tpu.matmul %90, %82, %cst_55 {dimension_numbers = #tpu.dot_dimension_numbers<[1], [0], [0], [1], [0, 0, 1, 1], [], []>} : vector<16x96xf32>, vector<96x32xf32>, vector<16x32xf32> -> vector<16x32xf32>
    %92 = vector.broadcast %84 : vector<1x32xf32> to vector<16x32xf32>
    %93 = arith.addf %91, %92 : vector<16x32xf32>
    %cst_56 = arith.constant 0.000000e+00 : f32
    %94 = vector.broadcast %cst_56 : f32 to vector<16x32xf32>
    %95 = arith.maximumf %93, %94 : vector<16x32xf32>
    %96 = vector.broadcast %65 : vector<16x1xf32> to vector<16x32xf32>
    %97 = arith.addf %95, %96 : vector<16x32xf32>
    %c2 = arith.constant 2 : index
    %c0_57 = arith.constant 0 : index
    %c0_58 = arith.constant 0 : index
    %98 = vector.load %arg8[%c2, %c0_57, %c0_58] : memref<4x1x32xf32, #tpu.memory_space<vmem>>, vector<1x1x32xf32>
    %99 = vector.shape_cast %98 : vector<1x1x32xf32> to vector<1x32xf32>
    %100 = vector.broadcast %99 : vector<1x32xf32> to vector<16x32xf32>
    %101 = arith.mulf %97, %100 : vector<16x32xf32>
    %cst_59 = arith.constant dense<0.000000e+00> : vector<16xf32>
    %102 = vector.multi_reduction <add>, %101, %cst_59 [1] : vector<16x32xf32> to vector<16xf32>
    %103 = vector.shape_cast %102 : vector<16xf32> to vector<16x1xf32>
    %c2_60 = arith.constant 2 : index
    %c0_61 = arith.constant 0 : index
    %c0_62 = arith.constant 0 : index
    %104 = vector.load %arg9[%c2_60, %c0_61, %c0_62] : memref<4x1x1xf32, #tpu.memory_space<vmem>>, vector<1x1x1xf32>
    %105 = vector.shape_cast %104 : vector<1x1x1xf32> to vector<1x1xf32>
    %106 = vector.broadcast %105 : vector<1x1xf32> to vector<16x1xf32>
    %107 = arith.addf %103, %106 : vector<16x1xf32>
    %c2_63 = arith.constant 2 : index
    %c0_64 = arith.constant 0 : index
    %c0_65 = arith.constant 0 : index
    %108 = vector.load %arg4[%c2_63, %c0_64, %c0_65] : memref<4x96x32xf32, #tpu.memory_space<vmem>>, vector<1x96x32xf32>
    %109 = vector.shape_cast %108 : vector<1x96x32xf32> to vector<96x32xf32>
    %c2_66 = arith.constant 2 : index
    %c0_67 = arith.constant 0 : index
    %c0_68 = arith.constant 0 : index
    %110 = vector.load %arg5[%c2_66, %c0_67, %c0_68] : memref<4x1x32xf32, #tpu.memory_space<vmem>>, vector<1x1x32xf32>
    %111 = vector.shape_cast %110 : vector<1x1x32xf32> to vector<1x32xf32>
    %cst_69 = arith.constant 0.000000e+00 : f32
    %112 = vector.broadcast %cst_69 : f32 to vector<16x32xf32>
    %113 = tpu.concatenate %112, %97 in 0 : vector<16x32xf32>, vector<16x32xf32> -> vector<32x32xf32>
    %114 = vector.extract_strided_slice %113 {offsets = [0, 0], sizes = [16, 32], strides = [1, 1]} : vector<32x32xf32> to vector<16x32xf32>
    %115 = vector.extract_strided_slice %113 {offsets = [8, 0], sizes = [16, 32], strides = [1, 1]} : vector<32x32xf32> to vector<16x32xf32>
    %116 = vector.extract_strided_slice %113 {offsets = [16, 0], sizes = [16, 32], strides = [1, 1]} : vector<32x32xf32> to vector<16x32xf32>
    %117 = tpu.concatenate %114, %115, %116 in 1 : vector<16x32xf32>, vector<16x32xf32>, vector<16x32xf32> -> vector<16x96xf32>
    %cst_70 = arith.constant dense<0.000000e+00> : vector<16x32xf32>
    %118 = tpu.matmul %117, %109, %cst_70 {dimension_numbers = #tpu.dot_dimension_numbers<[1], [0], [0], [1], [0, 0, 1, 1], [], []>} : vector<16x96xf32>, vector<96x32xf32>, vector<16x32xf32> -> vector<16x32xf32>
    %119 = vector.broadcast %111 : vector<1x32xf32> to vector<16x32xf32>
    %120 = arith.addf %118, %119 : vector<16x32xf32>
    %cst_71 = arith.constant 0.000000e+00 : f32
    %121 = vector.broadcast %cst_71 : f32 to vector<16x32xf32>
    %122 = arith.maximumf %120, %121 : vector<16x32xf32>
    %c2_72 = arith.constant 2 : index
    %c0_73 = arith.constant 0 : index
    %c0_74 = arith.constant 0 : index
    %123 = vector.load %arg6[%c2_72, %c0_73, %c0_74] : memref<4x96x32xf32, #tpu.memory_space<vmem>>, vector<1x96x32xf32>
    %124 = vector.shape_cast %123 : vector<1x96x32xf32> to vector<96x32xf32>
    %c2_75 = arith.constant 2 : index
    %c0_76 = arith.constant 0 : index
    %c0_77 = arith.constant 0 : index
    %125 = vector.load %arg7[%c2_75, %c0_76, %c0_77] : memref<4x1x32xf32, #tpu.memory_space<vmem>>, vector<1x1x32xf32>
    %126 = vector.shape_cast %125 : vector<1x1x32xf32> to vector<1x32xf32>
    %cst_78 = arith.constant 0.000000e+00 : f32
    %127 = vector.broadcast %cst_78 : f32 to vector<16x32xf32>
    %128 = tpu.concatenate %127, %122 in 0 : vector<16x32xf32>, vector<16x32xf32> -> vector<32x32xf32>
    %129 = vector.extract_strided_slice %128 {offsets = [0, 0], sizes = [16, 32], strides = [1, 1]} : vector<32x32xf32> to vector<16x32xf32>
    %130 = vector.extract_strided_slice %128 {offsets = [8, 0], sizes = [16, 32], strides = [1, 1]} : vector<32x32xf32> to vector<16x32xf32>
    %131 = vector.extract_strided_slice %128 {offsets = [16, 0], sizes = [16, 32], strides = [1, 1]} : vector<32x32xf32> to vector<16x32xf32>
    %132 = tpu.concatenate %129, %130, %131 in 1 : vector<16x32xf32>, vector<16x32xf32>, vector<16x32xf32> -> vector<16x96xf32>
    %cst_79 = arith.constant dense<0.000000e+00> : vector<16x32xf32>
    %133 = tpu.matmul %132, %124, %cst_79 {dimension_numbers = #tpu.dot_dimension_numbers<[1], [0], [0], [1], [0, 0, 1, 1], [], []>} : vector<16x96xf32>, vector<96x32xf32>, vector<16x32xf32> -> vector<16x32xf32>
    %134 = vector.broadcast %126 : vector<1x32xf32> to vector<16x32xf32>
    %135 = arith.addf %133, %134 : vector<16x32xf32>
    %cst_80 = arith.constant 0.000000e+00 : f32
    %136 = vector.broadcast %cst_80 : f32 to vector<16x32xf32>
    %137 = arith.maximumf %135, %136 : vector<16x32xf32>
    %138 = vector.broadcast %107 : vector<16x1xf32> to vector<16x32xf32>
    %139 = arith.addf %137, %138 : vector<16x32xf32>
    %c3 = arith.constant 3 : index
    %c0_81 = arith.constant 0 : index
    %c0_82 = arith.constant 0 : index
    %140 = vector.load %arg8[%c3, %c0_81, %c0_82] : memref<4x1x32xf32, #tpu.memory_space<vmem>>, vector<1x1x32xf32>
    %141 = vector.shape_cast %140 : vector<1x1x32xf32> to vector<1x32xf32>
    %142 = vector.broadcast %141 : vector<1x32xf32> to vector<16x32xf32>
    %143 = arith.mulf %139, %142 : vector<16x32xf32>
    %cst_83 = arith.constant dense<0.000000e+00> : vector<16xf32>
    %144 = vector.multi_reduction <add>, %143, %cst_83 [1] : vector<16x32xf32> to vector<16xf32>
    %145 = vector.shape_cast %144 : vector<16xf32> to vector<16x1xf32>
    %c3_84 = arith.constant 3 : index
    %c0_85 = arith.constant 0 : index
    %c0_86 = arith.constant 0 : index
    %146 = vector.load %arg9[%c3_84, %c0_85, %c0_86] : memref<4x1x1xf32, #tpu.memory_space<vmem>>, vector<1x1x1xf32>
    %147 = vector.shape_cast %146 : vector<1x1x1xf32> to vector<1x1xf32>
    %148 = vector.broadcast %147 : vector<1x1xf32> to vector<16x1xf32>
    %149 = arith.addf %145, %148 : vector<16x1xf32>
    %c3_87 = arith.constant 3 : index
    %c0_88 = arith.constant 0 : index
    %c0_89 = arith.constant 0 : index
    %150 = vector.load %arg4[%c3_87, %c0_88, %c0_89] : memref<4x96x32xf32, #tpu.memory_space<vmem>>, vector<1x96x32xf32>
    %151 = vector.shape_cast %150 : vector<1x96x32xf32> to vector<96x32xf32>
    %c3_90 = arith.constant 3 : index
    %c0_91 = arith.constant 0 : index
    %c0_92 = arith.constant 0 : index
    %152 = vector.load %arg5[%c3_90, %c0_91, %c0_92] : memref<4x1x32xf32, #tpu.memory_space<vmem>>, vector<1x1x32xf32>
    %153 = vector.shape_cast %152 : vector<1x1x32xf32> to vector<1x32xf32>
    %cst_93 = arith.constant 0.000000e+00 : f32
    %154 = vector.broadcast %cst_93 : f32 to vector<32x32xf32>
    %155 = tpu.concatenate %154, %139 in 0 : vector<32x32xf32>, vector<16x32xf32> -> vector<48x32xf32>
    %156 = vector.extract_strided_slice %155 {offsets = [0, 0], sizes = [16, 32], strides = [1, 1]} : vector<48x32xf32> to vector<16x32xf32>
    %157 = vector.extract_strided_slice %155 {offsets = [16, 0], sizes = [16, 32], strides = [1, 1]} : vector<48x32xf32> to vector<16x32xf32>
    %158 = vector.extract_strided_slice %155 {offsets = [32, 0], sizes = [16, 32], strides = [1, 1]} : vector<48x32xf32> to vector<16x32xf32>
    %159 = tpu.concatenate %156, %157, %158 in 1 : vector<16x32xf32>, vector<16x32xf32>, vector<16x32xf32> -> vector<16x96xf32>
    %cst_94 = arith.constant dense<0.000000e+00> : vector<16x32xf32>
    %160 = tpu.matmul %159, %151, %cst_94 {dimension_numbers = #tpu.dot_dimension_numbers<[1], [0], [0], [1], [0, 0, 1, 1], [], []>} : vector<16x96xf32>, vector<96x32xf32>, vector<16x32xf32> -> vector<16x32xf32>
    %161 = vector.broadcast %153 : vector<1x32xf32> to vector<16x32xf32>
    %162 = arith.addf %160, %161 : vector<16x32xf32>
    %cst_95 = arith.constant 0.000000e+00 : f32
    %163 = vector.broadcast %cst_95 : f32 to vector<16x32xf32>
    %164 = arith.maximumf %162, %163 : vector<16x32xf32>
    %c3_96 = arith.constant 3 : index
    %c0_97 = arith.constant 0 : index
    %c0_98 = arith.constant 0 : index
    %165 = vector.load %arg6[%c3_96, %c0_97, %c0_98] : memref<4x96x32xf32, #tpu.memory_space<vmem>>, vector<1x96x32xf32>
    %166 = vector.shape_cast %165 : vector<1x96x32xf32> to vector<96x32xf32>
    %c3_99 = arith.constant 3 : index
    %c0_100 = arith.constant 0 : index
    %c0_101 = arith.constant 0 : index
    %167 = vector.load %arg7[%c3_99, %c0_100, %c0_101] : memref<4x1x32xf32, #tpu.memory_space<vmem>>, vector<1x1x32xf32>
    %168 = vector.shape_cast %167 : vector<1x1x32xf32> to vector<1x32xf32>
    %cst_102 = arith.constant 0.000000e+00 : f32
    %169 = vector.broadcast %cst_102 : f32 to vector<32x32xf32>
    %170 = tpu.concatenate %169, %164 in 0 : vector<32x32xf32>, vector<16x32xf32> -> vector<48x32xf32>
    %171 = vector.extract_strided_slice %170 {offsets = [0, 0], sizes = [16, 32], strides = [1, 1]} : vector<48x32xf32> to vector<16x32xf32>
    %172 = vector.extract_strided_slice %170 {offsets = [16, 0], sizes = [16, 32], strides = [1, 1]} : vector<48x32xf32> to vector<16x32xf32>
    %173 = vector.extract_strided_slice %170 {offsets = [32, 0], sizes = [16, 32], strides = [1, 1]} : vector<48x32xf32> to vector<16x32xf32>
    %174 = tpu.concatenate %171, %172, %173 in 1 : vector<16x32xf32>, vector<16x32xf32>, vector<16x32xf32> -> vector<16x96xf32>
    %cst_103 = arith.constant dense<0.000000e+00> : vector<16x32xf32>
    %175 = tpu.matmul %174, %166, %cst_103 {dimension_numbers = #tpu.dot_dimension_numbers<[1], [0], [0], [1], [0, 0, 1, 1], [], []>} : vector<16x96xf32>, vector<96x32xf32>, vector<16x32xf32> -> vector<16x32xf32>
    %176 = vector.broadcast %168 : vector<1x32xf32> to vector<16x32xf32>
    %177 = arith.addf %175, %176 : vector<16x32xf32>
    %cst_104 = arith.constant 0.000000e+00 : f32
    %178 = vector.broadcast %cst_104 : f32 to vector<16x32xf32>
    %179 = arith.maximumf %177, %178 : vector<16x32xf32>
    %180 = vector.broadcast %149 : vector<16x1xf32> to vector<16x32xf32>
    %181 = arith.addf %179, %180 : vector<16x32xf32>
    %c0_105 = arith.constant 0 : index
    %c0_106 = arith.constant 0 : index
    %182 = vector.load %arg10[%c0_105, %c0_106] : memref<32x1024xf32, #tpu.memory_space<vmem>>, vector<32x1024xf32>
    %cst_107 = arith.constant dense<0.000000e+00> : vector<16x1024xf32>
    %183 = tpu.matmul %181, %182, %cst_107 {dimension_numbers = #tpu.dot_dimension_numbers<[1], [0], [0], [1], [0, 0, 1, 1], [], []>} : vector<16x32xf32>, vector<32x1024xf32>, vector<16x1024xf32> -> vector<16x1024xf32>
    %c0_108 = arith.constant 0 : index
    %c0_109 = arith.constant 0 : index
    %184 = vector.load %arg11[%c0_108, %c0_109] : memref<1x1024xf32, #tpu.memory_space<vmem>>, vector<1x1024xf32>
    %185 = vector.broadcast %184 : vector<1x1024xf32> to vector<16x1024xf32>
    %186 = arith.addf %183, %185 : vector<16x1024xf32>
    %cst_110 = arith.constant 0.000000e+00 : f32
    %187 = vector.broadcast %cst_110 : f32 to vector<16x1024xf32>
    %188 = arith.maximumf %186, %187 : vector<16x1024xf32>
    %c0_111 = arith.constant 0 : index
    %c0_112 = arith.constant 0 : index
    %189 = vector.load %arg12[%c0_111, %c0_112] : memref<1024x8xf32, #tpu.memory_space<vmem>>, vector<1024x8xf32>
    %cst_113 = arith.constant dense<0.000000e+00> : vector<16x8xf32>
    %190 = tpu.matmul %188, %189, %cst_113 {dimension_numbers = #tpu.dot_dimension_numbers<[1], [0], [0], [1], [0, 0, 1, 1], [], []>} : vector<16x1024xf32>, vector<1024x8xf32>, vector<16x8xf32> -> vector<16x8xf32>
    %c0_114 = arith.constant 0 : index
    %c0_115 = arith.constant 0 : index
    %191 = vector.load %arg13[%c0_114, %c0_115] : memref<1x8xf32, #tpu.memory_space<vmem>>, vector<1x8xf32>
    %192 = vector.broadcast %191 : vector<1x8xf32> to vector<16x8xf32>
    %193 = arith.addf %190, %192 : vector<16x8xf32>
    %c0_116 = arith.constant 0 : index
    %c0_117 = arith.constant 0 : index
    %c0_118 = arith.constant 0 : index
    %194 = vector.load %arg14[%c0_116, %c0_117, %c0_118] : memref<1x16x8xf32, #tpu.memory_space<vmem>>, vector<1x16x8xf32>
    %195 = vector.shape_cast %194 : vector<1x16x8xf32> to vector<16x8xf32>
    %196 = vector.shape_cast %193 : vector<16x8xf32> to vector<1x16x8xf32>
    tpu.vector_store %arg14[%c0_116, %c0_117, %c0_118], %196 {strides = array<i32>} : memref<1x16x8xf32, #tpu.memory_space<vmem>>, vector<1x16x8xf32>,
    return
  }
  func.func @transform_0(%arg0: i32) -> (i32, i32, i32) {
    %c0_i32 = arith.constant 0 : i32
    %c0_i32_0 = arith.constant 0 : i32
    %c0_i32_1 = arith.constant 0 : i32
    return %arg0, %c0_i32, %c0_i32_0 : i32, i32, i32
  }
  func.func @transform_1(%arg0: i32) -> (i32, i32) {
    %c0_i32 = arith.constant 0 : i32
    %c0_i32_0 = arith.constant 0 : i32
    %c0_i32_1 = arith.constant 0 : i32
    return %c0_i32, %c0_i32_0 : i32, i32
  }
  func.func @transform_2(%arg0: i32) -> (i32, i32) {
    %c0_i32 = arith.constant 0 : i32
    %c0_i32_0 = arith.constant 0 : i32
    %c0_i32_1 = arith.constant 0 : i32
    return %c0_i32, %c0_i32_0 : i32, i32
  }
  func.func @transform_3(%arg0: i32) -> (i32, i32, i32) {
    %c0_i32 = arith.constant 0 : i32
    %c0_i32_0 = arith.constant 0 : i32
    %c0_i32_1 = arith.constant 0 : i32
    %c0_i32_2 = arith.constant 0 : i32
    return %c0_i32, %c0_i32_0, %c0_i32_1 : i32, i32, i32
  }
  func.func @transform_4(%arg0: i32) -> (i32, i32, i32) {
    %c0_i32 = arith.constant 0 : i32
    %c0_i32_0 = arith.constant 0 : i32
    %c0_i32_1 = arith.constant 0 : i32
    %c0_i32_2 = arith.constant 0 : i32
    return %c0_i32, %c0_i32_0, %c0_i32_1 : i32, i32, i32
  }
  func.func @transform_5(%arg0: i32) -> (i32, i32, i32) {
    %c0_i32 = arith.constant 0 : i32
    %c0_i32_0 = arith.constant 0 : i32
    %c0_i32_1 = arith.constant 0 : i32
    %c0_i32_2 = arith.constant 0 : i32
    return %c0_i32, %c0_i32_0, %c0_i32_1 : i32, i32, i32
  }
  func.func @transform_6(%arg0: i32) -> (i32, i32, i32) {
    %c0_i32 = arith.constant 0 : i32
    %c0_i32_0 = arith.constant 0 : i32
    %c0_i32_1 = arith.constant 0 : i32
    %c0_i32_2 = arith.constant 0 : i32
    return %c0_i32, %c0_i32_0, %c0_i32_1 : i32, i32, i32
  }
  func.func @transform_7(%arg0: i32) -> (i32, i32, i32) {
    %c0_i32 = arith.constant 0 : i32
    %c0_i32_0 = arith.constant 0 : i32
    %c0_i32_1 = arith.constant 0 : i32
    %c0_i32_2 = arith.constant 0 : i32
    return %c0_i32, %c0_i32_0, %c0_i32_1 : i32, i32, i32
  }
  func.func @transform_8(%arg0: i32) -> (i32, i32, i32) {
    %c0_i32 = arith.constant 0 : i32
    %c0_i32_0 = arith.constant 0 : i32
    %c0_i32_1 = arith.constant 0 : i32
    %c0_i32_2 = arith.constant 0 : i32
    return %c0_i32, %c0_i32_0, %c0_i32_1 : i32, i32, i32
  }
  func.func @transform_9(%arg0: i32) -> (i32, i32) {
    %c0_i32 = arith.constant 0 : i32
    %c0_i32_0 = arith.constant 0 : i32
    %c0_i32_1 = arith.constant 0 : i32
    return %c0_i32, %c0_i32_0 : i32, i32
  }
  func.func @transform_10(%arg0: i32) -> (i32, i32) {
    %c0_i32 = arith.constant 0 : i32
    %c0_i32_0 = arith.constant 0 : i32
    %c0_i32_1 = arith.constant 0 : i32
    return %c0_i32, %c0_i32_0 : i32, i32
  }
  func.func @transform_11(%arg0: i32) -> (i32, i32) {
    %c0_i32 = arith.constant 0 : i32
    %c0_i32_0 = arith.constant 0 : i32
    %c0_i32_1 = arith.constant 0 : i32
    return %c0_i32, %c0_i32_0 : i32, i32
  }
  func.func @transform_12(%arg0: i32) -> (i32, i32) {
    %c0_i32 = arith.constant 0 : i32
    %c0_i32_0 = arith.constant 0 : i32
    %c0_i32_1 = arith.constant 0 : i32
    return %c0_i32, %c0_i32_0 : i32, i32
  }
  func.func @transform_13(%arg0: i32) -> (i32, i32, i32) {
    %c0_i32 = arith.constant 0 : i32
    %c0_i32_0 = arith.constant 0 : i32
    %c0_i32_1 = arith.constant 0 : i32
    return %arg0, %c0_i32, %c0_i32_0 : i32, i32, i32
  }
}

</mosaic_0001>

<bundles_post_ra>
// kernel: _lambda_.1
= control target key start
LH: loop header
LB: loop body
LE: loop exit
PB: predicated region body
PF: predicated region fallthrough
CT: control target
= control target key end

     0   :  { %s4334_s0 = inlined_call_operand.vmem [shape: f32[2,16,1], index: 0, kind: input, shape index: {}]   ;;  %s4335_s1 = inlined_call_operand.vmem [shape: f32[3,32], index: 1, kind: input, shape index: {}]   ;;  %s4336_s2 = inlined_call_operand.vmem [shape: f32[1,32], index: 2, kind: input, shape index: {}]   ;;  %s4337_s3 = inlined_call_operand.hbm [shape: f32[4,96,32], index: 3, kind: input, shape index: {}]   ;;  %s4338_s4 = inlined_call_operand.vmem [shape: f32[4,1,32], index: 4, kind: input, shape index: {}]   ;;  %s4339_s5 = inlined_call_operand.hbm [shape: f32[4,96,32], index: 5, kind: input, shape index: {}]   ;;  %s4340_s6 = inlined_call_operand.vmem [shape: f32[4,1,32], index: 6, kind: input, shape index: {}]   ;;  %s4341_s7 = inlined_call_operand.vmem [shape: f32[4,1,32], index: 7, kind: input, shape index: {}]   ;;  %s4342_s8 = inlined_call_operand.vmem [shape: f32[4,1,1], index: 8, kind: input, shape index: {}]   ;;  %s4343_s9 = inlined_call_operand.hbm [shape: f32[32,1024], index: 9, kind: input, shape index: {}]   ;;  %s4344_s10 = inlined_call_operand.vmem [shape: f32[1,1024], index: 10, kind: input, shape index: {}]   ;;  %s4345_s11 = inlined_call_operand.hbm [shape: f32[1024,8], index: 11, kind: input, shape index: {}]   ;;  %s4346_s12 = inlined_call_operand.vmem [shape: f32[1,8], index: 12, kind: input, shape index: {}]   ;;  %s4347_s13 = inlined_call_operand.vmem [shape: f32[2,16,8], index: 13, kind: output, shape index: {}]  }
   0x1   :  { %4353 = sst [smem:[#allocation13_spill]] %s4347_s13 }
   0x2   :  { %18 = vsyncpa [#allocation3], 0 }
   0x3   :  { %19 = vsyncpa [#allocation5], 0 }
   0x4   :  { %20 = vsyncpa [#allocation8], 0  ;;  %s3922_s25 = smov 0  }
   0x5 LB: > { %4354 = sst [smem:[#allocation12_spill]] %s3836_s25  ;;  %s3928_s26 = sadd.s32 4294967295, %s3836_s25   ;;  %s3836_s25 = sphi %s3922_s25, %s26_s25  }
   0x6   : > { %p2729_p0 = scmp.ge.s32.totalorder %s3836_s25, 1  ;;  %p335_p1 = scmp.lt.s32.totalorder %s3836_s25, 3 }
   0x7   : > { %p4351_p2 = scmp.eq.s32.totalorder %s3928_s26, 0  ;;  %s3838_s28 = smov [#allocation4]  }
   0x8   : > { %p3933_p3 = pnand %p2729_p0, %p335_p1  ;;  %s369_s29 = sshll.u32 %s3838_s28, 4  ;;  %s3937_s29 = int_to_ptr.vmem [resolvable:$true] %s369_s29 }
   0x9   : > { %s3839_s30 = smov [#allocation2]   ;;  %s3840_s16 = smov [#allocation6]  }
   0xa   : > { %s4355_s27 = scalar_select %p3933_p3, 1, 0 }
   0xb   : > { %p3661_p4 = pneg %p3933_p3  ;;  %s353_s14 = sshll.u32 %s3839_s30, 4  ;;  %s3941_s14 = int_to_ptr.vmem [resolvable:$true] %s353_s14 }
   0xc   : > { %s391_s17 = sshll.u32 %s3840_s16, 4  ;;  %s3706_s20 = scalar_lea.hbm %s4339_s5, 6144  ;;  %s3949_s17 = int_to_ptr.vmem [resolvable:$true] %s391_s17 }
   0xd   : > { %p3945_p5 = pnand %p4351_p2, %p3661_p4  ;;  %p3707_p6 = scmp.ne.s32.totalorder %s4339_s5, %s3706_s20 }
   0xe   : > { %p3713_p10 = scmp.lt.u32.totalorder %s3706_s20, %s4339_s5 }
   0xf   : > { %p3959_p7 = pneg %p3945_p5 }
  0x11   : > { %p3709_p8 = pnand %p3959_p7, %p3707_p6 }
  0x13   : > { %p3710_p9 = pneg %p3709_p8 }
  0x15   : > { %p3715_p11 = pnand %p3713_p10, %p3710_p9 }
  0x17   : > { %3718 = shalt.err (!%p3715_p11)
}
  0x18   : > { %s3719_s30 = scalar_lea.vmem %s3937_s29, 6144  ;;  %p3727_p1 = scmp.lt.s32.totalorder %s3937_s29, %s3937_s29 }
  0x19   : > { %p3720_p12 = scmp.ne.s32.totalorder %s3937_s29, %s3719_s30  ;;  %p3728_p4 = scmp.lt.s32.totalorder %s3719_s30, %s3719_s30 }
  0x1b   : > { %p3722_p13 = pnand %p3720_p12, %p3959_p7  ;;  %p3729_p6 = por %p3728_p4, %p3727_p1 }
  0x1d   : > { %p3723_p0 = pneg %p3722_p13 }
  0x1f   : > { %p3730_p8 = pnand %p3729_p6, %p3723_p0 }
  0x21   : > { %3733 = shalt.err (!%p3730_p8)
}
  0x22   : > { %s4349_s16 = smov 128   ;;  %s4350_s18 = smov 8  }
  0x23   : > { %3667 = dma.hbm_to_vmem [thread:$0]  (!%p3945_p5), %s4339_s5, 6144, %s3937_s29, [#allocation5], %s4349_s16, %s4349_s16, %s4350_s18  }
  0x24   : > { %s3734_s24 = scalar_lea.hbm %s4337_s3, 6144 }
  0x25   : > { %p3735_p9 = scmp.ne.s32.totalorder %s4337_s3, %s3734_s24  ;;  %p3741_p12 = scmp.lt.u32.totalorder %s3734_s24, %s4337_s3 }
  0x27   : > { %p3737_p10 = pnand %p3735_p9, %p3959_p7 }
  0x29   : > { %p3738_p11 = pneg %p3737_p10 }
  0x2b   : > { %p3743_p13 = pnand %p3741_p12, %p3738_p11 }
  0x2d   : > { %3746 = shalt.err (!%p3743_p13)
}
  0x2e   : > { %s3747_s29 = scalar_lea.vmem %s3941_s14, 6144  ;;  %p3755_p6 = scmp.lt.s32.totalorder %s3941_s14, %s3941_s14 }
  0x2f   : > { %p3748_p0 = scmp.ne.s32.totalorder %s3941_s14, %s3747_s29  ;;  %p3756_p8 = scmp.lt.s32.totalorder %s3747_s29, %s3747_s29 }
  0x31   : > { %p3750_p1 = pnand %p3748_p0, %p3959_p7  ;;  %p3757_p9 = por %p3756_p8, %p3755_p6 }
  0x33   : > { %p3751_p4 = pneg %p3750_p1 }
  0x35   : > { %p3758_p10 = pnand %p3757_p9, %p3751_p4 }
  0x37   : > { %3761 = shalt.err (!%p3758_p10)
}
  0x38   : > { %3664 = dma.hbm_to_vmem [thread:$0]  (!%p3945_p5), %s4337_s3, 6144, %s3941_s14, [#allocation3], %s4349_s16, %s4349_s16, %s4350_s18  }
  0x39   : > { %s3762_s21 = scalar_lea.hbm %s4343_s9, 4096 }
  0x3a   : > { %p3763_p11 = scmp.ne.s32.totalorder %s4343_s9, %s3762_s21  ;;  %p3769_p0 = scmp.lt.u32.totalorder %s3762_s21, %s4343_s9 }
  0x3c   : > { %p3765_p12 = pnand %p3763_p11, %p3959_p7 }
  0x3e   : > { %p3766_p13 = pneg %p3765_p12 }
  0x40   : > { %p3771_p1 = pnand %p3769_p0, %p3766_p13 }
  0x42   : > { %3774 = shalt.err (!%p3771_p1)
}
  0x43   : > { %s3775_s14 = scalar_lea.vmem %s3949_s17, 4096  ;;  %p3783_p9 = scmp.lt.s32.totalorder %s3949_s17, %s3949_s17 }
  0x44   : > { %p3776_p4 = scmp.ne.s32.totalorder %s3949_s17, %s3775_s14  ;;  %p3784_p10 = scmp.lt.s32.totalorder %s3775_s14, %s3775_s14 }
  0x46   : > { %p3778_p6 = pnand %p3776_p4, %p3959_p7  ;;  %p3785_p11 = por %p3784_p10, %p3783_p9 }
  0x48   : > { %p3779_p8 = pneg %p3778_p6 }
  0x4a   : > { %p3786_p12 = pnand %p3785_p11, %p3779_p8 }
  0x4c   : > { %3789 = shalt.err (!%p3786_p12)
}
  0x4d   : > { %s3843_s29 = smov 1024   ;;  %s3844_s13 = smov 64  }
  0x4e   : > { %3670 = dma.hbm_to_vmem [thread:$0]  (!%p3945_p5), %s4343_s9, 4096, %s3949_s17, [#allocation5], %s3843_s29, %s3843_s29, %s3844_s13  }
  0x4f   : > { %s3845_s20 = smov [#allocation7]   ;;  %s3790_s28 = scalar_lea.hbm %s4345_s11, 16384 }
  0x50   : > { %s407_s21 = sshll.u32 %s3845_s20, 4  ;;  %p3791_p13 = scmp.ne.s32.totalorder %s4345_s11, %s3790_s28  ;;  %s408_s21 = int_to_ptr.vmem [resolvable:$true] %s407_s21 }
  0x51   : > { %p3797_p4 = scmp.lt.u32.totalorder %s3790_s28, %s4345_s11 }
  0x52   : > { %p3793_p0 = pnand %p3791_p13, %p3959_p7 }
  0x54   : > { %p3794_p1 = pneg %p3793_p0 }
  0x56   : > { %p3799_p6 = pnand %p3797_p4, %p3794_p1 }
  0x58   : > { %3802 = shalt.err (!%p3799_p6)
}
  0x59   : > { %s3803_s17 = scalar_lea.vmem %s408_s21, 16384  ;;  %p3811_p11 = scmp.lt.s32.totalorder %s408_s21, %s408_s21 }
  0x5a   : > { %p3804_p8 = scmp.ne.s32.totalorder %s408_s21, %s3803_s17  ;;  %p3812_p12 = scmp.lt.s32.totalorder %s3803_s17, %s3803_s17 }
  0x5c   : > { %p3806_p9 = pnand %p3804_p8, %p3959_p7  ;;  %p3813_p2 = por %p3812_p12, %p3811_p11 }
  0x5e   : > { %p3807_p10 = pneg %p3806_p9 }
  0x60   : > { %p3814_p3 = pnand %p3813_p2, %p3807_p10 }
  0x62   : > { %3817 = shalt.err (!%p3814_p3)
}
  0x63   : > { %s4358_s29 = smov 8   ;;  %s4359_s13 = smov 128  }
  0x64   : > { %3673 = dma.hbm_to_vmem [thread:$0]  (!%p3945_p5), %s4345_s11, 16384, %s408_s21, [#allocation8], %s4359_s13, %s4359_s13, %s4358_s29  }
  0x65   : > { %p4360_p13 = scmp.ne.s32.totalorder %s4355_s27, 0 }
  0x66   : > { %p4361_p7 = scmp.eq.s32.totalorder (!%p4360_p13), %s3928_s26, 0 }
  0x67   : > { %434 = sbr.rel (%p4360_p13) target bundleno = 3667 (0xe53), region = 72 }
  0x6e   : > { %3823 = dma.done.wait (%p4361_p7), [#allocation3], 6144   ;;  %p4362_p0 = pmov %p4361_p7 }
  0x70   : > { %3825 = vsyncadd (%p4362_p0), [#allocation3], 4294961152  ;;  %p4363_p2 = pmov %p4362_p0 }
  0x71   : > { %p4364_p3 = pmov %p4362_p0 }
  0x72   : > { %3827 = dma.done.wait (%p4363_p2), [#allocation5], 10240  }
  0x73   : > { %3829 = vsyncadd (%p4364_p3), [#allocation5], 4294957056  ;;  %p4365_p1 = pmov %p4362_p0 }
  0x74   : > { %p4366_p5 = pmov %p4362_p0 }
  0x75   : > { %3831 = dma.done.wait (%p4365_p1), [#allocation8], 16384  }
  0x76   : > { %3833 = vsyncadd (%p4366_p5), [#allocation8], 4294950912  ;;  %p490_p4 = scmp.lt.s32.totalorder %s3928_s26, 1  ;;  %vm560_vm0 = vcmask 1042432   ;;  %vm506_vm1 = vcmask 1040384   ;;  %vm517_vm2 = vcmask 1046528  }
  0x77   : > { %v502_v2 = vld [vmem:[%s4335_s1] sm:$0x7]  ;;  %vm529_vm3 = vcmask 1045504   ;;  %s3846_s21 = smov 1   ;;  %s3847_s22 = smov 2   ;;  %vm541_vm4 = vcmask 7168  }
  0x78   : > { %s4370_s26 = smov (!%p490_p4, %s3928_s26), 1  ;;  %3072 = vmatprep.subr.msk.mxu0 %vm560_vm0, %v502_v2  ;;  %vm544_vm5 = vcmask 15360   ;;  %vm553_vm6 = vcmask 23552   ;;  %v664_v26 = vld [vmem:[#allocation2] sm:$0xff]  ;;  %v665_v27 = vld [vmem:[#allocation2 + $0x8] sm:$0xff]  ;;  %v666_v28 = vld [vmem:[#allocation2 + $0x10] sm:$0xff] }
  0x79   : > { %s2803_s27 = sshll.u32 %s4370_s26, 4  ;;  %3073 = vmatpush3.msk.msra.mxu0 %vm560_vm0, %v502_v2  ;;  %v3293_v29 = vpack.c.bf16 %v665_v27, %v664_v26  ;;  %v667_v30 = vld [vmem:[#allocation2 + $0x18] sm:$0xff]  ;;  %v668_v32 = vld [vmem:[#allocation2 + $0x20] sm:$0xff]  ;;  %v669_v33 = vld [vmem:[#allocation2 + $0x28] sm:$0xff]  ;;  %vm679_vm7 = vcmask 1043456   ;;  %s3848_s30 = smov 32  }
  0x7a   : > { %s494_s25 = scalar_lea.vmem %s4334_s0, %s2803_s27  ;;  %v3297_v31 = vpack.c.bf16 %v667_v30, %v666_v28  ;;  %v3301_v34 = vpack.c.bf16 %v669_v33, %v668_v32  ;;  %v670_v35 = vld [vmem:[#allocation2 + $0x30] sm:$0xff]  ;;  %v671_v36 = vld [vmem:[#allocation2 + $0x38] sm:$0xff]  ;;  %v672_v38 = vld [vmem:[#allocation2 + $0x40] sm:$0xff]  ;;  %s3849_s14 = smov 64   ;;  %vm711_vm8 = vcmask 523264   ;;  %vm648_vm9 = vcmask 261120  }
  0x7b   : > { %v500_v0 = vld [vmem:[%s494_s25] sm:$0xff]  ;;  %v501_v1 = vld [vmem:[%s494_s25 + $0x8] sm:$0xff]  ;;  %3294 = vmatprep.subr.bf16.mxu1 %v3293_v29  ;;  %v3305_v37 = vpack.c.bf16 %v671_v36, %v670_v35  ;;  %v674_v41 = vld [vmem:[#allocation2 + $0x50] sm:$0xff]  ;;  %vm720_vm10 = vcmask 785408   ;;  %s4367_s25 = sld [smem:[#allocation13_spill]]  ;;  %vm2628_vm11 = vcmask 64512  }
  0x7c   : > { %v507_v3 = vrot.slane %v500_v0, 7  ;;  %v508_v4 = vrot.slane %v501_v1, 7  ;;  %3296 = vmatpush3.bf16.msra.mxu1 %v3293_v29  ;;  %v673_v39 = vld [vmem:[#allocation2 + $0x48] sm:$0xff]  ;;  %v675_v42 = vld [vmem:[#allocation2 + $0x58] sm:$0xff]  ;;  %v2744_v44 = vld [vmem:[%s4336_s2] ss:$0 sm:$0xff] }
  0x7d   : > { %3298 = vmatprep.subr.bf16.mxu1 %v3297_v31  ;;  %v3309_v40 = vpack.c.bf16 %v673_v39, %v672_v38  ;;  %v3313_v43 = vpack.c.bf16 %v675_v42, %v674_v41 }
  0x7e   : > { %v509_v5 = vsel %vm506_vm1, %v507_v3, %v508_v4  ;;  %v513_v6 = vsel %vm506_vm1, 0.0, %v507_v3  ;;  %v514_v7 = vsel %vm506_vm1, %v508_v4, 0.0 }
  0x7f   : > { %v518_v8 = vrot.slane %v513_v6, 1  ;;  %v519_v9 = vrot.slane %v509_v5, 1  ;;  %v530_v10 = vrot.slane %v513_v6, 2  ;;  %v531_v11 = vrot.slane %v509_v5, 2 }
  0x80   : > { %v521_v12 = vrot.slane %v514_v7, 1  ;;  %v533_v13 = vrot.slane %v514_v7, 2  ;;  %3300 = vmatpush3.bf16.msra.mxu1 %v3297_v31  ;;  %v804_v7 = vld [vmem:[#allocation4] sm:$0xff] }
  0x81   : > { %v520_v14 = vsel %vm517_vm2, %v518_v8, %v519_v9  ;;  %v532_v15 = vsel %vm529_vm3, %v530_v10, %v531_v11  ;;  %3302 = vmatprep.subr.bf16.mxu1 %v3301_v34  ;;  %v805_v8 = vld [vmem:[#allocation4 + $0x8] sm:$0xff]  ;;  %s499_s19 = scalar_lea.vmem %s4367_s25, %s2803_s27 }
  0x82   : > { %523 = vrot.lane.b32.xlu0 %v520_v14, %s3846_s21  ;;  %535 = vrot.lane.b32.xlu1 %v532_v15, %s3847_s22  ;;  %v522_v16 = vsel %vm517_vm2, %v519_v9, %v521_v12  ;;  %v534_v17 = vsel %vm529_vm3, %v531_v11, %v533_v13  ;;  %v806_v9 = vld [vmem:[#allocation4 + $0x10] sm:$0xff]  ;;  %v3317_v10 = vpack.c.bf16 %v805_v8, %v804_v7  ;;  %v807_v11 = vld [vmem:[#allocation4 + $0x18] sm:$0xff]  ;;  %v808_v13 = vld [vmem:[#allocation4 + $0x20] sm:$0xff] }
  0x83   : > { %v3321_v12 = vpack.c.bf16 %v807_v11, %v806_v9  ;;  %v809_v14 = vld [vmem:[#allocation4 + $0x28] sm:$0xff]  ;;  %v984_v7 = vld [vmem:[#allocation2 + $0x80] sm:$0xff]  ;;  %v987_v11 = vld [vmem:[#allocation2 + $0x98] sm:$0xff] }
  0x84   : > { %3304 = vmatpush3.bf16.msra.mxu1 %v3301_v34  ;;  %3318 = vmatprep.subr.bf16.mxu0 %v3317_v10  ;;  %v3325_v15 = vpack.c.bf16 %v809_v14, %v808_v13  ;;  %v985_v8 = vld [vmem:[#allocation2 + $0x88] sm:$0xff]  ;;  %v988_v13 = vld [vmem:[#allocation2 + $0xa0] sm:$0xff] }
  0x85   : > { %3306 = vmatprep.subr.bf16.mxu1 %v3305_v37  ;;  %v3349_v9 = vpack.c.bf16 %v985_v8, %v984_v7  ;;  %v989_v14 = vld [vmem:[#allocation2 + $0xa8] sm:$0xff] }
  0x86   : > { %525 = vrot.lane.b32.xlu0 %v522_v16, %s3846_s21  ;;  %537 = vrot.lane.b32.xlu1 %v534_v17, %s3847_s22  ;;  %v810_v16 = vld [vmem:[#allocation4 + $0x30] sm:$0xff]  ;;  %v811_v17 = vld [vmem:[#allocation4 + $0x38] sm:$0xff] }
  0x88   : > { %3308 = vmatpush3.bf16.msra.mxu1 %v3305_v37 }
  0x89   : > { %3310 = vmatprep.subr.bf16.mxu1 %v3309_v40 }
  0x8c   : > { %3312 = vmatpush3.bf16.msra.mxu1 %v3309_v40 }
  0x8d   : > { %3314 = vmatprep.subr.bf16.mxu1 %v3313_v43 }
  0x90   : > { %3316 = vmatpush3.bf16.msra.mxu1 %v3313_v43 }
  0xf4   : > { %v524_v18 = vpop.permute.xlu0 %523  ;;  %v536_v19 = vpop.permute.xlu1 %535 }
  0xf5   : > { %v542_v20 = vsel %vm541_vm4, %v513_v6, %v524_v18  ;;  %v3329_v18 = vpack.c.bf16 %v811_v17, %v810_v16  ;;  %v3357_v16 = vpack.c.bf16 %v989_v14, %v988_v13 }
  0xf6   : > { %v545_v21 = vsel %vm544_vm5, %v542_v20, %v536_v19  ;;  %v812_v19 = vld [vmem:[#allocation4 + $0x40] sm:$0xff]  ;;  %v813_v20 = vld [vmem:[#allocation4 + $0x48] sm:$0xff] }
  0xf7   : > { %3074 = vmatprep.mubr.msk.f32.mxu0 %vm553_vm6, %v545_v21  ;;  %v3333_v21 = vpack.c.bf16 %v813_v20, %v812_v19  ;;  %v990_v20 = vld [vmem:[#allocation2 + $0xb0] sm:$0xff] }
  0xf8   : > { %v526_v22 = vpop.permute.xlu0 %525  ;;  %v538_v23 = vpop.permute.xlu1 %537 }
  0xf9   : > { %v543_v24 = vsel %vm541_vm4, %v509_v5, %v526_v22  ;;  %v2750_v22 = vld [vmem:[%s4338_s4] ss:$0 sm:$0xff] }
  0xfa   : > { %v546_v25 = vsel %vm544_vm5, %v543_v24, %v538_v23  ;;  %v814_v23 = vld [vmem:[#allocation4 + $0x50] sm:$0xff]  ;;  %v815_v24 = vld [vmem:[#allocation4 + $0x58] sm:$0xff] }
  0xfb   : > { %3075 = vmatmul.mubr.msk.f32.vlgmr.msra.gmra.mrb[0].mxu0 %vm553_vm6, %v546_v25  ;;  %v3337_v25 = vpack.c.bf16 %v815_v24, %v814_v23 }
  0xfc   : > { %3320 = vmatpush3.bf16.msra.mxu0 %v3317_v10  ;;  %v986_v10 = vld [vmem:[#allocation2 + $0x90] sm:$0xff] }
  0xfd   : > { %3322 = vmatprep.subr.bf16.mxu0 %v3321_v12 }
 0x100   : > { %3324 = vmatpush3.bf16.msra.mxu0 %v3321_v12  ;;  %v3353_v12 = vpack.c.bf16 %v987_v11, %v986_v10 }
 0x101   : > { %3326 = vmatprep.subr.bf16.mxu0 %v3325_v15 }
 0x104   : > { %3328 = vmatpush3.bf16.msra.mxu0 %v3325_v15  ;;  %v2753_v15 = vld [vmem:[%s4340_s6] ss:$0 sm:$0xff] }
 0x105   : > { %3330 = vmatprep.subr.bf16.mxu0 %v3329_v18 }
 0x108   : > { %3332 = vmatpush3.bf16.msra.mxu0 %v3329_v18 }
 0x109   : > { %3334 = vmatprep.subr.bf16.mxu0 %v3333_v21 }
 0x10c   : > { %3336 = vmatpush3.bf16.msra.mxu0 %v3333_v21  ;;  %v991_v21 = vld [vmem:[#allocation2 + $0xb8] sm:$0xff] }
 0x10d   : > { %3338 = vmatprep.subr.bf16.mxu0 %v3337_v25  ;;  %v3361_v23 = vpack.c.bf16 %v991_v21, %v990_v20 }
 0x110   : > { %3340 = vmatpush3.bf16.msra.mxu0 %v3337_v25 }
 0x1ce   : > { %v3076_v45 = vpop.f32.mrb[0].mxu0 }
 0x1cf   : > { %v4087_v46 = vadd.f32 %v3076_v45, %v2744_v44  ;;  %v630_v47 = vpop.f32.mrb[1].mxu0 }
 0x1d0   : > { %v4089_v48 = vadd.f32 %v2744_v44, %v630_v47  ;;  %v2748_v47 = vld [vmem:[%s4341_s7] ss:$0 sm:$0xff] }
 0x1d1   : > { %v681_v49 = vrot.slane %v4087_v46, 4 }
 0x1d2   : > { %v680_v50 = vrot.slane %v4089_v48, 4 }
 0x1d3   : > { %v690_v54 = vrot.slane %v681_v49, 2  ;;  %v701_v60 = vrot.slane %v681_v49, 4 }
 0x1d4   : > { %v682_v51 = vsel %vm679_vm7, %v680_v50, %v681_v49  ;;  %v685_v52 = vsel %vm679_vm7, 0.0, %v680_v50  ;;  %v646_v49 = vmul.f32 %v2748_v47, %v4089_v48 }
 0x1d5   : > { %v688_v53 = vrot.slane %v682_v51, 2  ;;  %v687_v55 = vrot.slane %v685_v52, 2  ;;  %v699_v58 = vrot.slane %v682_v51, 4  ;;  %v698_v59 = vrot.slane %v685_v52, 4 }
 0x1d6   : > { %v649_v50 = vsel %vm648_vm9, %v646_v49, 0.0 }
 0x1d7   : > { %v691_v56 = vsel %vm529_vm3, %v688_v53, %v690_v54  ;;  %v689_v57 = vsel %vm529_vm3, %v687_v55, %v688_v53  ;;  %v702_v61 = vsel %vm679_vm7, %v699_v58, %v701_v60  ;;  %v700_v62 = vsel %vm679_vm7, %v698_v59, %v699_v58 }
 0x1d8   : > { %694 = vrot.lane.b32.xlu1 %v691_v56, %s3848_s30  ;;  %692 = vrot.lane.b32.xlu0 %v689_v57, %s3848_s30  ;;  %v3850_v53 = vmov 0  }
 0x1d9   : > { %3704 = vset.pattern.permute.xlu0 %v3850_v53  ;;  %3705 = vset.pattern.permute.xlu1 %v3850_v53  ;;  %v1113_v53 = vld [vmem:[#allocation4 + $0x88] sm:$0xff] }
 0x1dc   : > { %705 = vrot.lane.b32.xlu1 %v702_v61, %s3849_s14  ;;  %703 = vrot.lane.b32.xlu0 %v700_v62, %s3849_s14 }
 0x24a   : > { %v695_v63 = vpop.permute.xlu1 %694  ;;  %v693_v0 = vpop.permute.xlu0 %692 }
 0x24b   : > { %v710_v1 = vsel %vm648_vm9, %v682_v51, %v695_v63  ;;  %v709_v2 = vsel %vm648_vm9, %v685_v52, %v693_v0  ;;  %v647_v51 = vmul.f32 %v2748_v47, %v4087_v46  ;;  %v2749_v46 = vld [vmem:[%s4342_s8] ss:$0 sm:$0xff]  ;;  %v1110_v47 = vld [vmem:[#allocation4 + $0x70] sm:$0xff] }
 0x24d   : > { %v652_v52 = vsel %vm648_vm9, %v647_v51, 0.0 }
 0x24e   : > { %v706_v3 = vpop.permute.xlu1 %705  ;;  %v704_v4 = vpop.permute.xlu0 %703 }
 0x24f   : > { %v713_v5 = vsel %vm711_vm8, %v710_v1, %v706_v3  ;;  %v712_v6 = vsel %vm711_vm8, %v709_v2, %v704_v4  ;;  %v980_v1 = vld [vmem:[#allocation2 + $0x60] sm:$0xff]  ;;  %v981_v2 = vld [vmem:[#allocation2 + $0x68] sm:$0xff]  ;;  %v982_v3 = vld [vmem:[#allocation2 + $0x70] sm:$0xff] }
 0x250   : > { %3101 = vmatprep.mubr.msk.f32.mxu1 %vm720_vm10, %v712_v6  ;;  %v3341_v4 = vpack.c.bf16 %v981_v2, %v980_v1 }
 0x251   : > { %3102 = vmatmul.mubr.msk.f32.vlgmr.msra.gmra.mrb[0].mxu1 %vm720_vm10, %v713_v5  ;;  %v983_v5 = vld [vmem:[#allocation2 + $0x78] sm:$0xff] }
 0x252   : > { %v3345_v6 = vpack.c.bf16 %v983_v5, %v982_v3  ;;  %3342 = vmatprep.subr.bf16.mxu1 %v3341_v4 }
 0x253   : > { %3344 = vmatpush3.bf16.msra.mxu1 %v3341_v4 }
 0x254   : > { %3346 = vmatprep.subr.bf16.mxu1 %v3345_v6 }
 0x257   : > { %3348 = vmatpush3.bf16.msra.mxu1 %v3345_v6 }
 0x258   : > { %3350 = vmatprep.subr.bf16.mxu1 %v3349_v9 }
 0x25b   : > { %3352 = vmatpush3.bf16.msra.mxu1 %v3349_v9  ;;  %v2757_v9 = vld [vmem:[%s4341_s7 + $0x1] ss:$0 sm:$0xff] }
 0x25c   : > { %3354 = vmatprep.subr.bf16.mxu1 %v3353_v12 }
 0x25f   : > { %3356 = vmatpush3.bf16.msra.mxu1 %v3353_v12 }
 0x260   : > { %3358 = vmatprep.subr.bf16.mxu1 %v3357_v16 }
 0x263   : > { %3360 = vmatpush3.bf16.msra.mxu1 %v3357_v16 }
 0x264   : > { %3362 = vmatprep.subr.bf16.mxu1 %v3361_v23 }
 0x267   : > { %3364 = vmatpush3.bf16.msra.mxu1 %v3361_v23 }
 0x324   : > { %v3103_v26 = vpop.f32.mrb[0].mxu1 }
 0x325   : > { %v799_v27 = vadd.f32 %v3103_v26, %v2750_v22  ;;  %v793_v28 = vpop.f32.mrb[1].mxu1 }
 0x326   : > { %v794_v29 = vadd.f32 %v2750_v22, %v793_v28 }
 0x327   : > { %v803_v30 = vmax.f32 %v799_v27, 0.0 }
 0x328   : > { %v802_v31 = vmax.f32 %v794_v29, 0.0  ;;  %v3851_v29 = vmov 0.0  }
 0x329   : > { %v820_v32 = vrot.slane %v803_v30, 4  ;;  %v997_v30 = vrot.slane %v3851_v29, 4 }
 0x32a   : > { %v819_v33 = vrot.slane %v802_v31, 4 }
 0x32b   : > { %v829_v36 = vrot.slane %v820_v32, 2  ;;  %v840_v43 = vrot.slane %v820_v32, 4 }
 0x32c   : > { %v821_v34 = vsel %vm679_vm7, %v819_v33, %v820_v32  ;;  %v824_v35 = vsel %vm679_vm7, 0.0, %v819_v33 }
 0x32d   : > { %v826_v37 = vrot.slane %v824_v35, 2  ;;  %v827_v38 = vrot.slane %v821_v34, 2  ;;  %v837_v39 = vrot.slane %v824_v35, 4  ;;  %v838_v42 = vrot.slane %v821_v34, 4 }
 0x32f   : > { %v830_v40 = vsel %vm529_vm3, %v827_v38, %v829_v36  ;;  %v828_v41 = vsel %vm529_vm3, %v826_v37, %v827_v38  ;;  %v841_v44 = vsel %vm679_vm7, %v838_v42, %v840_v43  ;;  %v839_v45 = vsel %vm679_vm7, %v837_v39, %v838_v42 }
 0x330   : > { %833 = vrot.lane.b32.xlu1 %v830_v40, %s3848_s30  ;;  %831 = vrot.lane.b32.xlu0 %v828_v41, %s3848_s30 }
 0x334   : > { %844 = vrot.lane.b32.xlu1 %v841_v44, %s3849_s14  ;;  %842 = vrot.lane.b32.xlu0 %v839_v45, %s3849_s14  ;;  %v1108_v44 = vld [vmem:[#allocation4 + $0x60] sm:$0xff]  ;;  %v1109_v45 = vld [vmem:[#allocation4 + $0x68] sm:$0xff] }
 0x335   : > { %v3365_v49 = vpack.c.bf16 %v1109_v45, %v1108_v44  ;;  %v1283_v44 = vld [vmem:[#allocation2 + $0x118] sm:$0xff] }
 0x337   : > { %3366 = vmatprep.subr.bf16.mxu0 %v3365_v49 }
 0x353   : > { %650 = vadd.xlane.f32.xlu0 %v649_v50  ;;  %v1111_v50 = vld [vmem:[#allocation4 + $0x78] sm:$0xff] }
 0x354   : > { %v3369_v51 = vpack.c.bf16 %v1111_v50, %v1110_v47  ;;  %v2765_v47 = vld [vmem:[%s4340_s6 + $0x1] ss:$0 sm:$0xff] }
 0x358   : > { %653 = vadd.xlane.f32.xlu1 %v652_v52  ;;  %v1112_v52 = vld [vmem:[#allocation4 + $0x80] sm:$0xff] }
 0x3a2   : > { %v834_v54 = vpop.permute.xlu1 %833  ;;  %v832_v55 = vpop.permute.xlu0 %831 }
 0x3a3   : > { %v849_v56 = vsel %vm648_vm9, %v821_v34, %v834_v54  ;;  %v848_v57 = vsel %vm648_vm9, %v824_v35, %v832_v55  ;;  %v3373_v54 = vpack.c.bf16 %v1113_v53, %v1112_v52  ;;  %v1114_v55 = vld [vmem:[#allocation4 + $0x90] sm:$0xff] }
 0x3a6   : > { %v845_v58 = vpop.permute.xlu1 %844  ;;  %v843_v59 = vpop.permute.xlu0 %842 }
 0x3a7   : > { %v851_v48 = vsel %vm711_vm8, %v849_v56, %v845_v58  ;;  %v850_v60 = vsel %vm711_vm8, %v848_v57, %v843_v59  ;;  %v1115_v56 = vld [vmem:[#allocation4 + $0x98] sm:$0xff]  ;;  %v1116_v58 = vld [vmem:[#allocation4 + $0xa0] sm:$0xff]  ;;  %v1117_v59 = vld [vmem:[#allocation4 + $0xa8] sm:$0xff] }
 0x3a8   : > { %3128 = vmatprep.mubr.msk.f32.mxu0 %vm720_vm10, %v850_v60  ;;  %v3377_v57 = vpack.c.bf16 %v1115_v56, %v1114_v55  ;;  %v2761_v60 = vld [vmem:[%s4338_s4 + $0x1] ss:$0 sm:$0xff] }
 0x3a9   : > { %3129 = vmatmul.mubr.msk.f32.vlgmr.msra.gmra.mrb[2].mxu0 %vm720_vm10, %v851_v48  ;;  %v3381_v48 = vpack.c.bf16 %v1117_v59, %v1116_v58 }
 0x3aa   : > { %3368 = vmatpush3.bf16.msra.mxu0 %v3365_v49 }
 0x3ab   : > { %3370 = vmatprep.subr.bf16.mxu0 %v3369_v51 }
 0x3ae   : > { %3372 = vmatpush3.bf16.msra.mxu0 %v3369_v51 }
 0x3af   : > { %3374 = vmatprep.subr.bf16.mxu0 %v3373_v54 }
 0x3b2   : > { %3376 = vmatpush3.bf16.msra.mxu0 %v3373_v54 }
 0x3b3   : > { %3378 = vmatprep.subr.bf16.mxu0 %v3377_v57 }
 0x3b6   : > { %3380 = vmatpush3.bf16.msra.mxu0 %v3377_v57 }
 0x3b7   : > { %3382 = vmatprep.subr.bf16.mxu0 %v3381_v48 }
 0x3ba   : > { %3384 = vmatpush3.bf16.msra.mxu0 %v3381_v48 }
 0x3e0   : > { %v651_v61 = vpop.xlane.xlu0 %650 }
 0x3e1   : > { %v662_v62 = vadd.f32 %v2749_v46, %v651_v61  ;;  %v1119_v61 = vld [vmem:[#allocation4 + $0xb8] sm:$0xff] }
 0x3e3   : > { %943 = vperm.xlu0 %3704, %v662_v62  }
 0x3e5   : > { %v654_v63 = vpop.xlane.xlu1 %653 }
 0x3e6   : > { %v663_v0 = vadd.f32 %v2749_v46, %v654_v63  ;;  %v1118_v46 = vld [vmem:[#allocation4 + $0xb0] sm:$0xff] }
 0x3e7   : > { %v3385_v62 = vpack.c.bf16 %v1119_v61, %v1118_v46 }
 0x3e8   : > { %948 = vperm.xlu1 %3705, %v663_v0  }
 0x3e9   : > { %3386 = vmatprep.subr.bf16.mxu0 %v3385_v62 }
 0x3ea   : > { %3388 = vmatpush3.bf16.msra.mxu0 %v3385_v62 }
 0x462   : > { %v944_v26 = vpop.permute.xlu0 %943 }
 0x467   : > { %v949_v27 = vpop.permute.xlu1 %948 }
 0x47c   : > { %v3130_v17 = vpop.f32.mrb[2].mxu0 }
 0x47d   : > { %v936_v18 = vadd.f32 %v3130_v17, %v2753_v15  ;;  %v930_v19 = vpop.f32.mrb[3].mxu0 }
 0x47e   : > { %v931_v22 = vadd.f32 %v2753_v15, %v930_v19 }
 0x47f   : > { %v940_v24 = vmax.f32 %v936_v18, 0.0 }
 0x480   : > { %v939_v25 = vmax.f32 %v931_v22, 0.0  ;;  %v2759_v22 = vld [vmem:[%s4342_s8 + $0x1] ss:$0 sm:$0xff] }
 0x481   : > { %v4144_v31 = vadd.f32 %v949_v27, %v940_v24  ;;  %v1272_v27 = vld [vmem:[#allocation2 + $0xc0] sm:$0xff] }
 0x482   : > { %v4141_v28 = vadd.f32 %v944_v26, %v939_v25 }
 0x483   : > { %v1000_v34 = vrot.slane %v4144_v31, 4  ;;  %v962_v12 = vmul.f32 %v2757_v9, %v4144_v31 }
 0x484   : > { %1008 = vrot.lane.b32.xlu1 %v4141_v28, %s3849_s14  ;;  %v998_v32 = vrot.slane %v4141_v28, 4  ;;  %v961_v10 = vmul.f32 %v2757_v9, %v4141_v28 }
 0x485   : > { %v966_v13 = vsel %vm648_vm9, %v962_v12, 0.0 }
 0x486   : > { %v999_v33 = vsel %vm679_vm7, %v997_v30, %v998_v32  ;;  %v1001_v35 = vsel %vm679_vm7, %v998_v32, %v1000_v34  ;;  %v963_v11 = vsel %vm648_vm9, %v961_v10, 0.0  ;;  %v1275_v32 = vld [vmem:[#allocation2 + $0xd8] sm:$0xff]  ;;  %v1276_v34 = vld [vmem:[#allocation2 + $0xe0] sm:$0xff]  ;;  %v1400_v10 = vld [vmem:[#allocation4 + $0xf0] sm:$0xff] }
 0x488   : > { %1002 = vrot.lane.b32.xlu1 %v999_v33, %s3848_s30 }
 0x48c   : > { %1004 = vrot.lane.b32.xlu1 %v1001_v35, %s3848_s30  ;;  %v1277_v35 = vld [vmem:[#allocation2 + $0xe8] sm:$0xff] }
 0x490   : > { %1010 = vrot.lane.b32.xlu1 %v4144_v31, %s3849_s14 }
 0x4f6   : > { %v1009_v36 = vpop.permute.xlu1 %1008 }
 0x4fa   : > { %v1003_v37 = vpop.permute.xlu1 %1002 }
 0x4fb   : > { %v1014_v38 = vsel %vm648_vm9, 0.0, %v1003_v37  ;;  %v1278_v37 = vld [vmem:[#allocation2 + $0xf0] sm:$0xff] }
 0x4fc   : > { %v1016_v39 = vsel %vm711_vm8, %v1014_v38, %v1009_v36  ;;  %v3397_v36 = vpack.c.bf16 %v1277_v35, %v1276_v34  ;;  %v1279_v38 = vld [vmem:[#allocation2 + $0xf8] sm:$0xff] }
 0x4fd   : > { %3155 = vmatprep.mubr.msk.f32.mxu1 %vm720_vm10, %v1016_v39  ;;  %v3401_v39 = vpack.c.bf16 %v1279_v38, %v1278_v37  ;;  %v2771_v38 = vld [vmem:[%s4342_s8 + $0x2] ss:$0 sm:$0xff] }
 0x4fe   : > { %v1005_v40 = vpop.permute.xlu1 %1004 }
 0x4ff   : > { %v1015_v41 = vsel %vm648_vm9, %v4141_v28, %v1005_v40  ;;  %v1273_v28 = vld [vmem:[#allocation2 + $0xc8] sm:$0xff]  ;;  %v1280_v40 = vld [vmem:[#allocation2 + $0x100] sm:$0xff] }
 0x500   : > { %v3389_v31 = vpack.c.bf16 %v1273_v28, %v1272_v27 }
 0x502   : > { %v1011_v42 = vpop.permute.xlu1 %1010  ;;  %3390 = vmatprep.subr.bf16.mxu1 %v3389_v31 }
 0x503   : > { %v1017_v43 = vsel %vm711_vm8, %v1015_v41, %v1011_v42  ;;  %v1281_v41 = vld [vmem:[#allocation2 + $0x108] sm:$0xff] }
 0x504   : > { %3156 = vmatmul.mubr.msk.f32.vlgmr.msra.gmra.mrb[2].mxu1 %vm720_vm10, %v1017_v43  ;;  %v3405_v42 = vpack.c.bf16 %v1281_v41, %v1280_v40  ;;  %v1282_v43 = vld [vmem:[#allocation2 + $0x110] sm:$0xff] }
 0x505   : > { %3392 = vmatpush3.bf16.msra.mxu1 %v3389_v31  ;;  %v3409_v45 = vpack.c.bf16 %v1283_v44, %v1282_v43  ;;  %v1550_v43 = vld [vmem:[#allocation2 + $0x120] sm:$0xff]  ;;  %v1551_v44 = vld [vmem:[#allocation2 + $0x128] sm:$0xff] }
 0x5d7   : > { %v3157_v63 = vpop.f32.mrb[2].mxu1 }
 0x5d8   : > { %v1102_v0 = vadd.f32 %v3157_v63, %v2761_v60  ;;  %v1096_v1 = vpop.f32.mrb[3].mxu1 }
 0x5d9   : > { %v1097_v2 = vadd.f32 %v2761_v60, %v1096_v1  ;;  %v1394_v1 = vld [vmem:[#allocation4 + $0xc0] sm:$0xff] }
 0x5da   : > { %v1106_v3 = vmax.f32 %v1102_v0, 0.0 }
 0x5db   : > { %v1105_v4 = vmax.f32 %v1097_v2, 0.0  ;;  %v1395_v2 = vld [vmem:[#allocation4 + $0xc8] sm:$0xff] }
 0x5dc   : > { %v1126_v6 = vrot.slane %v1106_v3, 4 }
 0x5dd   : > { %v1124_v5 = vrot.slane %v1105_v4, 4  ;;  %1134 = vrot.lane.b32.xlu0 %v1105_v4, %s3849_s14 }
 0x5df   : > { %v1125_v7 = vsel %vm679_vm7, %v997_v30, %v1124_v5  ;;  %v1127_v8 = vsel %vm679_vm7, %v1124_v5, %v1126_v6  ;;  %v1274_v30 = vld [vmem:[#allocation2 + $0xd0] sm:$0xff]  ;;  %v1397_v5 = vld [vmem:[#allocation4 + $0xd8] sm:$0xff] }
 0x5e0   : > { %1128 = vrot.lane.b32.xlu1 %v1125_v7, %s3848_s30  ;;  %v3393_v33 = vpack.c.bf16 %v1275_v32, %v1274_v30  ;;  %v1398_v7 = vld [vmem:[#allocation4 + $0xe0] sm:$0xff] }
 0x5e2   : > { %3394 = vmatprep.subr.bf16.mxu1 %v3393_v33 }
 0x5e3   : > { %3396 = vmatpush3.bf16.msra.mxu1 %v3393_v33 }
 0x5e4   : > { %1130 = vrot.lane.b32.xlu1 %v1127_v8, %s3848_s30  ;;  %3398 = vmatprep.subr.bf16.mxu1 %v3397_v36  ;;  %v1399_v8 = vld [vmem:[#allocation4 + $0xe8] sm:$0xff] }
 0x5e5   : > { %v3421_v9 = vpack.c.bf16 %v1399_v8, %v1398_v7 }
 0x5e7   : > { %3400 = vmatpush3.bf16.msra.mxu1 %v3397_v36 }
 0x5e8   : > { %1136 = vrot.lane.b32.xlu1 %v1106_v3, %s3849_s14  ;;  %3402 = vmatprep.subr.bf16.mxu1 %v3401_v39  ;;  %v1396_v3 = vld [vmem:[#allocation4 + $0xd0] sm:$0xff] }
 0x5e9   : > { %v3417_v6 = vpack.c.bf16 %v1397_v5, %v1396_v3 }
 0x5eb   : > { %3404 = vmatpush3.bf16.msra.mxu1 %v3401_v39 }
 0x5ec   : > { %3406 = vmatprep.subr.bf16.mxu1 %v3405_v42 }
 0x5ef   : > { %3408 = vmatpush3.bf16.msra.mxu1 %v3405_v42 }
 0x5f0   : > { %3410 = vmatprep.subr.bf16.mxu1 %v3409_v45 }
 0x5f3   : > { %3412 = vmatpush3.bf16.msra.mxu1 %v3409_v45  ;;  %v1552_v45 = vld [vmem:[#allocation2 + $0x130] sm:$0xff] }
 0x5fc   : > { %964 = vadd.xlane.f32.xlu0 %v963_v11  ;;  %v1401_v11 = vld [vmem:[#allocation4 + $0xf8] sm:$0xff] }
 0x5fd   : > { %v3425_v12 = vpack.c.bf16 %v1401_v11, %v1400_v10 }
 0x60c   : > { %967 = vadd.xlane.f32.xlu1 %v966_v13  ;;  %v1402_v13 = vld [vmem:[#allocation4 + $0x100] sm:$0xff] }
 0x64f   : > { %v1135_v15 = vpop.permute.xlu0 %1134 }
 0x652   : > { %v1129_v14 = vpop.permute.xlu1 %1128 }
 0x653   : > { %v1140_v16 = vsel %vm648_vm9, 0.0, %v1129_v14  ;;  %v1403_v14 = vld [vmem:[#allocation4 + $0x108] sm:$0xff] }
 0x654   : > { %v1142_v17 = vsel %vm711_vm8, %v1140_v16, %v1135_v15  ;;  %v3429_v15 = vpack.c.bf16 %v1403_v14, %v1402_v13  ;;  %v1404_v16 = vld [vmem:[#allocation4 + $0x110] sm:$0xff]  ;;  %v1664_v13 = vld [vmem:[#allocation4 + $0x120] sm:$0xff]  ;;  %v1665_v14 = vld [vmem:[#allocation4 + $0x128] sm:$0xff] }
 0x655   : > { %3182 = vmatprep.mubr.msk.f32.mxu0 %vm720_vm10, %v1142_v17  ;;  %v1405_v17 = vld [vmem:[#allocation4 + $0x118] sm:$0xff] }
 0x656   : > { %v1131_v18 = vpop.permute.xlu1 %1130 }
 0x657   : > { %v1141_v19 = vsel %vm648_vm9, %v1105_v4, %v1131_v18  ;;  %v3413_v4 = vpack.c.bf16 %v1395_v2, %v1394_v1  ;;  %v3433_v18 = vpack.c.bf16 %v1405_v17, %v1404_v16  ;;  %v3461_v16 = vpack.c.bf16 %v1665_v14, %v1664_v13  ;;  %v1667_v17 = vld [vmem:[#allocation4 + $0x138] sm:$0xff]  ;;  %v1794_v13 = vld [vmem:[#allocation6 + $0x28] sm:$0xff] }
 0x658   : > { %v1802_v14 = vld [vmem:[#allocation6 + $0x68] sm:$0xff] }
 0x659   : > { %3414 = vmatprep.subr.bf16.mxu0 %v3413_v4 }
 0x65a   : > { %v1137_v20 = vpop.permute.xlu1 %1136 }
 0x65b   : > { %v1143_v21 = vsel %vm711_vm8, %v1141_v19, %v1137_v20  ;;  %v2773_v19 = vld [vmem:[%s4338_s4 + $0x2] ss:$0 sm:$0xff] }
 0x65c   : > { %3183 = vmatmul.mubr.msk.f32.vlgmr.msra.gmra.mrb[4].mxu0 %vm720_vm10, %v1143_v21 }
 0x65d   : > { %3416 = vmatpush3.bf16.msra.mxu0 %v3413_v4 }
 0x65e   : > { %3418 = vmatprep.subr.bf16.mxu0 %v3417_v6 }
 0x661   : > { %3420 = vmatpush3.bf16.msra.mxu0 %v3417_v6 }
 0x662   : > { %3422 = vmatprep.subr.bf16.mxu0 %v3421_v9 }
 0x665   : > { %3424 = vmatpush3.bf16.msra.mxu0 %v3421_v9 }
 0x666   : > { %3426 = vmatprep.subr.bf16.mxu0 %v3425_v12 }
 0x669   : > { %3428 = vmatpush3.bf16.msra.mxu0 %v3425_v12 }
 0x66a   : > { %3430 = vmatprep.subr.bf16.mxu0 %v3429_v15 }
 0x66d   : > { %3432 = vmatpush3.bf16.msra.mxu0 %v3429_v15  ;;  %v1666_v15 = vld [vmem:[#allocation4 + $0x130] sm:$0xff] }
 0x66e   : > { %3434 = vmatprep.subr.bf16.mxu0 %v3433_v18 }
 0x671   : > { %3436 = vmatpush3.bf16.msra.mxu0 %v3433_v18  ;;  %v3465_v18 = vpack.c.bf16 %v1667_v17, %v1666_v15  ;;  %v1796_v15 = vld [vmem:[#allocation6 + $0x38] sm:$0xff] }
 0x672   : > { %3462 = vmatprep.subr.bf16.mxu0 %v3461_v16  ;;  %v1804_v17 = vld [vmem:[#allocation6 + $0x78] sm:$0xff] }
 0x689   : > { %v965_v23 = vpop.xlane.xlu0 %964 }
 0x68a   : > { %v977_v24 = vadd.f32 %v2759_v22, %v965_v23 }
 0x68c   : > { %1235 = vperm.xlu0 %3704, %v977_v24  }
 0x690   : > { %1287 = vrot.lane.b32.xlu0 %v3851_v29, %s3848_s30 }
 0x699   : > { %v968_v25 = vpop.xlane.xlu1 %967 }
 0x69a   : > { %v978_v26 = vadd.f32 %v2759_v22, %v968_v25 }
 0x69c   : > { %1240 = vperm.xlu1 %3705, %v978_v26   ;;  %v2769_v26 = vld [vmem:[%s4341_s7 + $0x2] ss:$0 sm:$0xff] }
 0x70b   : > { %v1236_v54 = vpop.permute.xlu0 %1235 }
 0x70f   : > { %v1288_v59 = vpop.permute.xlu0 %1287 }
 0x710   : > { %v4197_v48 = vsel %vm648_vm9, 0.0, %v1288_v59 }
 0x71b   : > { %v1241_v57 = vpop.permute.xlu1 %1240 }
 0x72f   : > { %v3184_v49 = vpop.f32.mrb[4].mxu0 }
 0x730   : > { %v1222_v50 = vpop.f32.mrb[5].mxu0  ;;  %v1228_v51 = vadd.f32 %v3184_v49, %v2765_v47  ;;  %v1553_v49 = vld [vmem:[#allocation2 + $0x138] sm:$0xff] }
 0x731   : > { %v1223_v52 = vadd.f32 %v2765_v47, %v1222_v50  ;;  %v3437_v47 = vpack.c.bf16 %v1551_v44, %v1550_v43  ;;  %v3441_v50 = vpack.c.bf16 %v1553_v49, %v1552_v45 }
 0x732   : > { %v1232_v55 = vmax.f32 %v1228_v51, 0.0  ;;  %v1554_v51 = vld [vmem:[#allocation2 + $0x140] sm:$0xff] }
 0x733   : > { %v1231_v53 = vmax.f32 %v1223_v52, 0.0  ;;  %v1555_v52 = vld [vmem:[#allocation2 + $0x148] sm:$0xff]  ;;  %3438 = vmatprep.subr.bf16.mxu1 %v3437_v47 }
 0x734   : > { %v1244_v58 = vadd.f32 %v1241_v57, %v1232_v55  ;;  %v1557_v55 = vld [vmem:[#allocation2 + $0x158] sm:$0xff]  ;;  %v1558_v57 = vld [vmem:[#allocation2 + $0x160] sm:$0xff] }
 0x735   : > { %v1243_v56 = vadd.f32 %v1236_v54, %v1231_v53  ;;  %v3445_v53 = vpack.c.bf16 %v1555_v52, %v1554_v51  ;;  %v1556_v54 = vld [vmem:[#allocation2 + $0x150] sm:$0xff] }
 0x736   : > { %v1254_v27 = vmul.f32 %v2769_v26, %v1244_v58 }
 0x737   : > { %1294 = vrot.lane.b32.xlu0 %v1243_v56, %s3849_s14  ;;  %1289 = vrot.lane.b32.xlu1 %v1243_v56, %s3848_s30  ;;  %v1253_v28 = vmul.f32 %v2769_v26, %v1243_v56  ;;  %v3449_v56 = vpack.c.bf16 %v1557_v55, %v1556_v54  ;;  %v1673_v26 = vld [vmem:[#allocation4 + $0x168] sm:$0xff] }
 0x738   : > { %v1258_v30 = vsel %vm648_vm9, %v1254_v27, 0.0  ;;  %v1790_v55 = vld [vmem:[#allocation6 + $0x8] sm:$0xff] }
 0x739   : > { %v1255_v31 = vsel %vm648_vm9, %v1253_v28, 0.0  ;;  %v1674_v28 = vld [vmem:[#allocation4 + $0x170] sm:$0xff] }
 0x73b   : > { %1296 = vrot.lane.b32.xlu1 %v1244_v58, %s3849_s14  ;;  %v1559_v58 = vld [vmem:[#allocation2 + $0x168] sm:$0xff] }
 0x73c   : > { %v3453_v59 = vpack.c.bf16 %v1559_v58, %v1558_v57  ;;  %v1792_v57 = vld [vmem:[#allocation6 + $0x18] sm:$0xff] }
 0x73d   : > { %v1800_v58 = vld [vmem:[#allocation6 + $0x58] sm:$0xff] }
 0x7a9   : > { %v1290_v60 = vpop.permute.xlu1 %1289  ;;  %v1295_v46 = vpop.permute.xlu0 %1294 }
 0x7aa   : > { %v1302_v61 = vsel %vm711_vm8, %v4197_v48, %v1295_v46  ;;  %v1301_v62 = vsel %vm648_vm9, 0.0, %v1290_v60  ;;  %v1560_v60 = vld [vmem:[#allocation2 + $0x170] sm:$0xff]  ;;  %v1561_v46 = vld [vmem:[#allocation2 + $0x178] sm:$0xff] }
 0x7ab   : > { %3209 = vmatprep.mubr.msk.f32.mxu1 %vm720_vm10, %v1302_v61  ;;  %v3457_v61 = vpack.c.bf16 %v1561_v46, %v1560_v60  ;;  %v1797_v60 = vld [vmem:[#allocation6 + $0x40] sm:$0xff]  ;;  %v3493_v46 = vpack.c.bf16 %v1800_v58, %v1792_v57 }
 0x7ac   : > { %v2225_v58 = vld [vmem:[#allocation7 + $0x100] sm:$0xff] }
 0x7ad   : > { %v1297_v63 = vpop.permute.xlu1 %1296 }
 0x7ae   : > { %v1303_v0 = vsel %vm711_vm8, %v1301_v62, %v1297_v63  ;;  %v2777_v62 = vld [vmem:[%s4340_s6 + $0x2] ss:$0 sm:$0xff] }
 0x7af   : > { %3210 = vmatmul.mubr.msk.f32.vlgmr.msra.gmra.mrb[4].mxu1 %vm720_vm10, %v1303_v0 }
 0x7b0   : > { %3440 = vmatpush3.bf16.msra.mxu1 %v3437_v47 }
 0x7b1   : > { %3442 = vmatprep.subr.bf16.mxu1 %v3441_v50 }
 0x7b4   : > { %3444 = vmatpush3.bf16.msra.mxu1 %v3441_v50  ;;  %v2783_v50 = vld [vmem:[%s4342_s8 + $0x3] ss:$0 sm:$0xff] }
 0x7b5   : > { %3446 = vmatprep.subr.bf16.mxu1 %v3445_v53 }
 0x7b8   : > { %3448 = vmatpush3.bf16.msra.mxu1 %v3445_v53 }
 0x7b9   : > { %3450 = vmatprep.subr.bf16.mxu1 %v3449_v56 }
 0x7bc   : > { %3452 = vmatpush3.bf16.msra.mxu1 %v3449_v56  ;;  %v1798_v56 = vld [vmem:[#allocation6 + $0x48] sm:$0xff] }
 0x7bd   : > { %3454 = vmatprep.subr.bf16.mxu1 %v3453_v59 }
 0x7c0   : > { %3456 = vmatpush3.bf16.msra.mxu1 %v3453_v59  ;;  %v1789_v59 = vld [vmem:[#allocation6] sm:$0xff] }
 0x7c1   : > { %3458 = vmatprep.subr.bf16.mxu1 %v3457_v61 }
 0x7c4   : > { %3460 = vmatpush3.bf16.msra.mxu1 %v3457_v61  ;;  %v3487_v61 = vpack.c.bf16 %v1797_v60, %v1789_v59  ;;  %v2226_v59 = vld [vmem:[#allocation7 + $0x108] sm:$0xff]  ;;  %v2211_v60 = vld [vmem:[#allocation7 + $0x90] sm:$0xff] }
 0x882   : > { %v3211_v20 = vpop.f32.mrb[4].mxu1 }
 0x883   : > { %v1382_v21 = vpop.f32.mrb[5].mxu1  ;;  %v1388_v23 = vadd.f32 %v3211_v20, %v2773_v19  ;;  %v1669_v20 = vld [vmem:[#allocation4 + $0x148] sm:$0xff] }
 0x884   : > { %v1383_v22 = vadd.f32 %v2773_v19, %v1382_v21  ;;  %v1668_v19 = vld [vmem:[#allocation4 + $0x140] sm:$0xff] }
 0x885   : > { %v1392_v25 = vmax.f32 %v1388_v23, 0.0  ;;  %v3469_v21 = vpack.c.bf16 %v1669_v20, %v1668_v19  ;;  %v1671_v23 = vld [vmem:[#allocation4 + $0x158] sm:$0xff]  ;;  %v2789_v19 = vld [vmem:[%s4340_s6 + $0x3] ss:$0 sm:$0xff] }
 0x886   : > { %v1391_v24 = vmax.f32 %v1383_v22, 0.0  ;;  %v1670_v22 = vld [vmem:[#allocation4 + $0x150] sm:$0xff] }
 0x888   : > { %1413 = vrot.lane.b32.xlu1 %v1391_v24, %s3849_s14  ;;  %1409 = vrot.lane.b32.xlu0 %v1391_v24, %s3848_s30  ;;  %v3473_v24 = vpack.c.bf16 %v1671_v23, %v1670_v22  ;;  %v1793_v22 = vld [vmem:[#allocation6 + $0x20] sm:$0xff] }
 0x88c   : > { %1415 = vrot.lane.b32.xlu0 %v1392_v25, %s3849_s14  ;;  %v1672_v25 = vld [vmem:[#allocation4 + $0x160] sm:$0xff] }
 0x88d   : > { %v3477_v27 = vpack.c.bf16 %v1673_v26, %v1672_v25  ;;  %v1801_v25 = vld [vmem:[#allocation6 + $0x60] sm:$0xff]  ;;  %v1795_v26 = vld [vmem:[#allocation6 + $0x30] sm:$0xff] }
 0x8ab   : > { %1259 = vadd.xlane.f32.xlu0 %v1258_v30  ;;  %v1675_v30 = vld [vmem:[#allocation4 + $0x178] sm:$0xff] }
 0x8ac   : > { %1256 = vadd.xlane.f32.xlu1 %v1255_v31  ;;  %v3481_v31 = vpack.c.bf16 %v1675_v30, %v1674_v28  ;;  %v1810_v28 = vld [vmem:[#allocation6 + $0xa8] sm:$0xff] }
 0x8fa   : > { %v1414_v32 = vpop.permute.xlu1 %1413  ;;  %v1410_v33 = vpop.permute.xlu0 %1409 }
 0x8fb   : > { %v1420_v34 = vsel %vm711_vm8, %v4197_v48, %v1414_v32  ;;  %v1419_v35 = vsel %vm648_vm9, 0.0, %v1410_v33  ;;  %v2785_v32 = vld [vmem:[%s4338_s4 + $0x3] ss:$0 sm:$0xff] }
 0x8fc   : > { %3236 = vmatprep.mubr.msk.f32.mxu0 %vm720_vm10, %v1420_v34 }
 0x8fe   : > { %v1416_v36 = vpop.permute.xlu0 %1415 }
 0x8ff   : > { %v1421_v37 = vsel %vm711_vm8, %v1419_v35, %v1416_v36 }
 0x900   : > { %3237 = vmatmul.mubr.msk.f32.vlgmr.msra.gmra.mrb[6].mxu0 %vm720_vm10, %v1421_v37 }
 0x901   : > { %3464 = vmatpush3.bf16.msra.mxu0 %v3461_v16  ;;  %v3501_v16 = vpack.c.bf16 %v1802_v14, %v1794_v13  ;;  %v2197_v13 = vld [vmem:[#allocation7 + $0x20] sm:$0xff]  ;;  %v2198_v14 = vld [vmem:[#allocation7 + $0x28] sm:$0xff] }
 0x902   : > { %3466 = vmatprep.subr.bf16.mxu0 %v3465_v18 }
 0x905   : > { %3468 = vmatpush3.bf16.msra.mxu0 %v3465_v18  ;;  %v3509_v18 = vpack.c.bf16 %v1804_v17, %v1796_v15  ;;  %v2229_v17 = vld [vmem:[#allocation7 + $0x120] sm:$0xff] }
 0x906   : > { %3470 = vmatprep.subr.bf16.mxu0 %v3469_v21 }
 0x909   : > { %3472 = vmatpush3.bf16.msra.mxu0 %v3469_v21 }
 0x90a   : > { %3474 = vmatprep.subr.bf16.mxu0 %v3473_v24 }
 0x90d   : > { %3476 = vmatpush3.bf16.msra.mxu0 %v3473_v24 }
 0x90e   : > { %3478 = vmatprep.subr.bf16.mxu0 %v3477_v27 }
 0x911   : > { %3480 = vmatpush3.bf16.msra.mxu0 %v3477_v27  ;;  %v1803_v27 = vld [vmem:[#allocation6 + $0x70] sm:$0xff] }
 0x912   : > { %3482 = vmatprep.subr.bf16.mxu0 %v3481_v31 }
 0x915   : > { %3484 = vmatpush3.bf16.msra.mxu0 %v3481_v31  ;;  %v1818_v31 = vld [vmem:[#allocation6 + $0xe8] sm:$0xff] }
 0x916   : > { %3494 = vmatprep.subr.bf16.mxu0 %v3493_v46  ;;  %v2212_v46 = vld [vmem:[#allocation7 + $0x98] sm:$0xff] }
 0x938   : > { %v1260_v39 = vpop.xlane.xlu0 %1259 }
 0x939   : > { %v1270_v40 = vadd.f32 %v2771_v38, %v1260_v39  ;;  %v1257_v41 = vpop.xlane.xlu1 %1256  ;;  %v2781_v39 = vld [vmem:[%s4341_s7 + $0x3] ss:$0 sm:$0xff] }
 0x93a   : > { %v1269_v42 = vadd.f32 %v2771_v38, %v1257_v41 }
 0x93b   : > { %1518 = vperm.xlu1 %3705, %v1270_v40  }
 0x93c   : > { %1513 = vperm.xlu0 %3704, %v1269_v42  }
 0x9ba   : > { %v1519_v4 = vpop.permute.xlu1 %1518 }
 0x9bb   : > { %v1514_v6 = vpop.permute.xlu0 %1513 }
 0x9d3   : > { %v3238_v63 = vpop.f32.mrb[6].mxu0 }
 0x9d4   : > { %v1506_v0 = vadd.f32 %v3238_v63, %v2777_v62  ;;  %v1500_v1 = vpop.f32.mrb[7].mxu0  ;;  %v1799_v63 = vld [vmem:[#allocation6 + $0x50] sm:$0xff] }
 0x9d5   : > { %v1501_v2 = vadd.f32 %v2777_v62, %v1500_v1  ;;  %v1791_v62 = vld [vmem:[#allocation6 + $0x10] sm:$0xff]  ;;  %v1806_v1 = vld [vmem:[#allocation6 + $0x88] sm:$0xff] }
 0x9d6   : > { %v1510_v3 = vmax.f32 %v1506_v0, 0.0  ;;  %v3495_v0 = vpack.c.bf16 %v1799_v63, %v1791_v62  ;;  %v2244_v62 = vld [vmem:[#allocation7 + $0x198] sm:$0xff] }
 0x9d7   : > { %v1509_v5 = vmax.f32 %v1501_v2, 0.0  ;;  %v1814_v2 = vld [vmem:[#allocation6 + $0xc8] sm:$0xff] }
 0x9d8   : > { %v1522_v7 = vadd.f32 %v1519_v4, %v1510_v3  ;;  %v1808_v3 = vld [vmem:[#allocation6 + $0x98] sm:$0xff]  ;;  %v3489_v4 = vpack.c.bf16 %v1814_v2, %v1806_v1  ;;  %v2195_v1 = vld [vmem:[#allocation7 + $0x10] sm:$0xff] }
 0x9d9   : > { %v1521_v8 = vadd.f32 %v1514_v6, %v1509_v5  ;;  %v1816_v5 = vld [vmem:[#allocation6 + $0xd8] sm:$0xff]  ;;  %v1805_v6 = vld [vmem:[#allocation6 + $0x80] sm:$0xff] }
 0x9da   : > { %1568 = vrot.lane.b32.xlu0 %v1522_v7, %s3849_s14  ;;  %v1532_v40 = vmul.f32 %v2781_v39, %v1522_v7  ;;  %v1813_v7 = vld [vmem:[#allocation6 + $0xc0] sm:$0xff]  ;;  %v2196_v2 = vld [vmem:[#allocation7 + $0x18] sm:$0xff] }
 0x9db   : > { %1566 = vrot.lane.b32.xlu1 %v1521_v8, %s3849_s14  ;;  %v1531_v42 = vmul.f32 %v2781_v39, %v1521_v8  ;;  %v3497_v8 = vpack.c.bf16 %v1816_v5, %v1808_v3  ;;  %v3521_v3 = vpack.c.bf16 %v2212_v46, %v2211_v60  ;;  %v2227_v5 = vld [vmem:[#allocation7 + $0x110] sm:$0xff] }
 0x9dc   : > { %v1536_v41 = vsel %vm648_vm9, %v1532_v40, 0.0  ;;  %v1817_v40 = vld [vmem:[#allocation6 + $0xe0] sm:$0xff] }
 0x9dd   : > { %v1533_v43 = vsel %vm648_vm9, %v1531_v42, 0.0  ;;  %v1819_v42 = vld [vmem:[#allocation6 + $0xf0] sm:$0xff] }
 0xa4c   : > { %v1569_v9 = vpop.permute.xlu0 %1568 }
 0xa4d   : > { %v1567_v10 = vpop.permute.xlu1 %1566  ;;  %v1573_v12 = vsel %vm711_vm8, %v4197_v48, %v1569_v9  ;;  %v3491_v9 = vpack.c.bf16 %v1813_v7, %v1805_v6  ;;  %v2228_v6 = vld [vmem:[#allocation7 + $0x118] sm:$0xff]  ;;  %v2213_v7 = vld [vmem:[#allocation7 + $0xa0] sm:$0xff] }
 0xa4e   : > { %v1572_v11 = vsel %vm711_vm8, %v4197_v48, %v1567_v10  ;;  %v1807_v10 = vld [vmem:[#allocation6 + $0x90] sm:$0xff] }
 0xa4f   : > { %3263 = vmatprep.mubr.msk.f32.mxu1 %vm720_vm10, %v1572_v11  ;;  %v1815_v11 = vld [vmem:[#allocation6 + $0xd0] sm:$0xff] }
 0xa50   : > { %3264 = vmatmul.mubr.msk.f32.vlgmr.msra.gmra.mrb[6].mxu1 %vm720_vm10, %v1573_v12  ;;  %v3499_v12 = vpack.c.bf16 %v1815_v11, %v1807_v10  ;;  %v2246_v10 = vld [vmem:[#allocation7 + $0x1a8] sm:$0xff]  ;;  %v3523_v11 = vpack.c.bf16 %v2196_v2, %v2195_v1  ;;  %v2237_v1 = vld [vmem:[#allocation7 + $0x160] sm:$0xff] }
 0xa51   : > { %1933 = vmatprep.mubr.f32.mxu1 %v3851_v29  ;;  %v2238_v2 = vld [vmem:[#allocation7 + $0x168] sm:$0xff] }
 0xb23   : > { %v3265_v33 = vpop.f32.mrb[6].mxu1 }
 0xb24   : > { %v1658_v34 = vadd.f32 %v3265_v33, %v2785_v32  ;;  %v1652_v35 = vpop.f32.mrb[7].mxu1  ;;  %v1820_v33 = vld [vmem:[#allocation6 + $0xf8] sm:$0xff] }
 0xb25   : > { %v1653_v36 = vadd.f32 %v2785_v32, %v1652_v35  ;;  %v1812_v32 = vld [vmem:[#allocation6 + $0xb8] sm:$0xff]  ;;  %v3503_v35 = vpack.c.bf16 %v1801_v25, %v1793_v22  ;;  %v3527_v22 = vpack.c.bf16 %v2198_v14, %v2197_v13  ;;  %v2239_v14 = vld [vmem:[#allocation7 + $0x170] sm:$0xff] }
 0xb26   : > { %v1662_v37 = vmax.f32 %v1658_v34, 0.0  ;;  %v2200_v25 = vld [vmem:[#allocation7 + $0x38] sm:$0xff] }
 0xb27   : > { %v1661_v38 = vmax.f32 %v1653_v36, 0.0  ;;  %v3511_v36 = vpack.c.bf16 %v1803_v27, %v1795_v26 }
 0xb28   : > { %1682 = vrot.lane.b32.xlu0 %v1662_v37, %s3849_s14  ;;  %v1809_v37 = vld [vmem:[#allocation6 + $0xa0] sm:$0xff] }
 0xb29   : > { %1680 = vrot.lane.b32.xlu1 %v1661_v38, %s3849_s14 }
 0xb47   : > { %1537 = vadd.xlane.f32.xlu0 %v1536_v41  ;;  %v1811_v41 = vld [vmem:[#allocation6 + $0xb0] sm:$0xff] }
 0xb4d   : > { %1534 = vadd.xlane.f32.xlu1 %v1533_v43  ;;  %v3505_v43 = vpack.c.bf16 %v1818_v31, %v1810_v28  ;;  %v2231_v28 = vld [vmem:[#allocation7 + $0x130] sm:$0xff]  ;;  %v2217_v31 = vld [vmem:[#allocation7 + $0xc0] sm:$0xff] }
 0xb9a   : > { %v1683_v44 = vpop.permute.xlu0 %1682 }
 0xb9b   : > { %v1681_v45 = vpop.permute.xlu1 %1680  ;;  %v1687_v49 = vsel %vm711_vm8, %v4197_v48, %v1683_v44  ;;  %v3513_v44 = vpack.c.bf16 %v1820_v33, %v1812_v32  ;;  %v2218_v32 = vld [vmem:[#allocation7 + $0xc8] sm:$0xff]  ;;  %v2249_v33 = vld [vmem:[#allocation7 + $0x1c0] sm:$0xff] }
 0xb9c   : > { %v1686_v47 = vsel %vm711_vm8, %v4197_v48, %v1681_v45  ;;  %v3485_v48 = vpack.c.bf16 %v1798_v56, %v1790_v55  ;;  %v2209_v45 = vld [vmem:[#allocation7 + $0x80] sm:$0xff]  ;;  %v2194_v56 = vld [vmem:[#allocation7 + $0x8] sm:$0xff] }
 0xb9d   : > { %3290 = vmatprep.mubr.msk.f32.mxu0 %vm720_vm10, %v1686_v47  ;;  %v2210_v47 = vld [vmem:[#allocation7 + $0x88] sm:$0xff]  ;;  %v2193_v55 = vld [vmem:[#allocation7] sm:$0xff] }
 0xb9e   : > { %3291 = vmatmul.mubr.msk.f32.vlgmr.msra.gmra.mrb[8].mxu0 %vm720_vm10, %v1687_v49  ;;  %3486 = vmatprep.subr.bf16.mxu1 %v3485_v48  ;;  %v2241_v49 = vld [vmem:[#allocation7 + $0x180] sm:$0xff]  ;;  %v3517_v57 = vpack.c.bf16 %v2210_v47, %v2209_v45  ;;  %v3519_v63 = vpack.c.bf16 %v2194_v56, %v2193_v55  ;;  %v2251_v45 = vld [vmem:[#allocation7 + $0x1d0] sm:$0xff]  ;;  %v2252_v47 = vld [vmem:[#allocation7 + $0x1d8] sm:$0xff] }
 0xb9f   : > { %2010 = vmatprep.mubr.f32.mxu0 %v3851_v29  ;;  %3488 = vmatpush1.bf16.msra.mxu1 %v3487_v61  ;;  %v2243_v61 = vld [vmem:[#allocation7 + $0x190] sm:$0xff]  ;;  %v2236_v56 = vld [vmem:[#allocation7 + $0x158] sm:$0xff] }
 0xba0   : > { %3496 = vmatpush1.bf16.msra.mxu0 %v3495_v0  ;;  %3490 = vmatprep.subr.bf16.mxu1 %v3489_v4  ;;  %v3551_v0 = vpack.c.bf16 %v2226_v59, %v2225_v58  ;;  %v3553_v4 = vpack.c.bf16 %v2244_v62, %v2243_v61  ;;  %v2235_v55 = vld [vmem:[#allocation7 + $0x150] sm:$0xff]  ;;  %v2253_v58 = vld [vmem:[#allocation7 + $0x1e0] sm:$0xff]  ;;  %v2254_v59 = vld [vmem:[#allocation7 + $0x1e8] sm:$0xff] }
 0xba1   : > { %3498 = vmatprep.subr.bf16.mxu0 %v3497_v8  ;;  %v2214_v8 = vld [vmem:[#allocation7 + $0xa8] sm:$0xff]  ;;  %v3571_v46 = vpack.c.bf16 %v2236_v56, %v2235_v55  ;;  %v2205_v61 = vld [vmem:[#allocation7 + $0x60] sm:$0xff] }
 0xba2   : > { %v3525_v15 = vpack.c.bf16 %v2214_v8, %v2213_v7  ;;  %v2255_v7 = vld [vmem:[#allocation7 + $0x1f0] sm:$0xff] }
 0xba3   : > { %3492 = vmatpush1.bf16.msra.mxu1 %v3491_v9  ;;  %v2245_v9 = vld [vmem:[#allocation7 + $0x1a0] sm:$0xff] }
 0xba4   : > { %3500 = vmatpush1.bf16.msra.mxu0 %v3499_v12  ;;  %3502 = vmatprep.subr.bf16.mxu1 %v3501_v16  ;;  %v3555_v12 = vpack.c.bf16 %v2228_v6, %v2227_v5  ;;  %v3557_v16 = vpack.c.bf16 %v2246_v10, %v2245_v9  ;;  %v2223_v5 = vld [vmem:[#allocation7 + $0xf0] sm:$0xff]  ;;  %v2224_v6 = vld [vmem:[#allocation7 + $0xf8] sm:$0xff] }
 0xba5   : > { %3510 = vmatprep.subr.bf16.mxu0 %v3509_v18  ;;  %v2230_v18 = vld [vmem:[#allocation7 + $0x128] sm:$0xff]  ;;  %v3545_v8 = vpack.c.bf16 %v2224_v6, %v2223_v5  ;;  %v2256_v9 = vld [vmem:[#allocation7 + $0x1f8] sm:$0xff]  ;;  %v2207_v10 = vld [vmem:[#allocation7 + $0x70] sm:$0xff] }
 0xba6   : > { %v2292_v6 = vld [vmem:[#allocation7 + $0x318] sm:$0xff] }
 0xbd4   : > { %v1538_v51 = vpop.xlane.xlu0 %1537 }
 0xbd5   : > { %v1548_v52 = vadd.f32 %v2783_v50, %v1538_v51 }
 0xbd7   : > { %1784 = vperm.xlu1 %3705, %v1548_v52   ;;  %v3507_v52 = vpack.c.bf16 %v1817_v40, %v1809_v37  ;;  %v2201_v37 = vld [vmem:[#allocation7 + $0x40] sm:$0xff] }
 0xbda   : > { %v1535_v53 = vpop.xlane.xlu1 %1534 }
 0xbdb   : > { %v1547_v54 = vadd.f32 %v2783_v50, %v1535_v53  ;;  %v2242_v50 = vld [vmem:[#allocation7 + $0x188] sm:$0xff]  ;;  %v3515_v53 = vpack.c.bf16 %v1819_v42, %v1811_v41  ;;  %v2233_v41 = vld [vmem:[#allocation7 + $0x140] sm:$0xff] }
 0xbdc   : > { %v3549_v48 = vpack.c.bf16 %v2242_v50, %v2241_v49  ;;  %v2234_v42 = vld [vmem:[#allocation7 + $0x148] sm:$0xff] }
 0xbdd   : > { %1779 = vperm.xlu0 %3704, %v1547_v54   ;;  %v3567_v50 = vpack.c.bf16 %v2234_v42, %v2233_v41  ;;  %v2275_v41 = vld [vmem:[#allocation7 + $0x290] sm:$0xff] }
 0xc56   : > { %v1785_v51 = vpop.permute.xlu1 %1784 }
 0xc5c   : > { %v1780_v34 = vpop.permute.xlu0 %1779 }
 0xc71   : > { %v3292_v20 = vpop.f32.mrb[8].mxu0 }
 0xc72   : > { %v1766_v21 = vpop.f32.mrb[9].mxu0  ;;  %v1772_v23 = vadd.f32 %v3292_v20, %v2789_v19  ;;  %v2216_v20 = vld [vmem:[#allocation7 + $0xb8] sm:$0xff] }
 0xc73   : > { %v1767_v24 = vadd.f32 %v2789_v19, %v1766_v21  ;;  %v2215_v19 = vld [vmem:[#allocation7 + $0xb0] sm:$0xff] }
 0xc74   : > { %v1776_v38 = vmax.f32 %v1772_v23, 0.0  ;;  %v2247_v21 = vld [vmem:[#allocation7 + $0x1b0] sm:$0xff]  ;;  %v3559_v23 = vpack.c.bf16 %v2230_v18, %v2229_v17  ;;  %v3529_v26 = vpack.c.bf16 %v2216_v20, %v2215_v19  ;;  %v2273_v17 = vld [vmem:[#allocation7 + $0x280] sm:$0xff]  ;;  %v2274_v18 = vld [vmem:[#allocation7 + $0x288] sm:$0xff] }
 0xc75   : > { %v1775_v30 = vmax.f32 %v1767_v24, 0.0  ;;  %v2199_v24 = vld [vmem:[#allocation7 + $0x30] sm:$0xff]  ;;  %v2305_v19 = vld [vmem:[#allocation7 + $0x380] sm:$0xff]  ;;  %v3581_v20 = vpack.c.bf16 %v2274_v18, %v2273_v17 }
 0xc76   : > { %v1788_v54 = vadd.f32 %v1785_v51, %v1776_v38  ;;  %v2202_v38 = vld [vmem:[#allocation7 + $0x48] sm:$0xff]  ;;  %v2203_v51 = vld [vmem:[#allocation7 + $0x50] sm:$0xff] }
 0xc77   : > { %v1787_v39 = vadd.f32 %v1780_v34, %v1775_v30  ;;  %v2232_v30 = vld [vmem:[#allocation7 + $0x138] sm:$0xff]  ;;  %v2250_v34 = vld [vmem:[#allocation7 + $0x1c8] sm:$0xff]  ;;  %v3535_v49 = vpack.c.bf16 %v2202_v38, %v2201_v37 }
 0xc78   : > { %v3565_v40 = vpack.c.bf16 %v2250_v34, %v2249_v33  ;;  %v2257_v34 = vld [vmem:[#allocation7 + $0x200] sm:$0xff] }
 0xc79   : > { %2792 = vmatmul.mubr.msk.f32.vlgmr.msra.gmra.mrb[8].mxu1 %vm648_vm9, %v1787_v39  ;;  %2794 = vmatmul.mubr.msk.f32.vlgmr.msra.gmra.mrb[10].mxu0 %vm648_vm9, %v1787_v39 }
 0xc7a   : > { %3504 = vmatpush1.bf16.msra.mxu1 %v3503_v35  ;;  %3512 = vmatpush1.bf16.msra.mxu0 %v3511_v36  ;;  %v3531_v35 = vpack.c.bf16 %v2200_v25, %v2199_v24  ;;  %v3563_v36 = vpack.c.bf16 %v2232_v30, %v2231_v28 }
 0xc7b   : > { %1939 = vmatprep.mubr.f32.mxu1 %v3851_v29  ;;  %2016 = vmatprep.mubr.f32.mxu0 %v3851_v29 }
 0xc7c   : > { %3506 = vmatprep.subr.bf16.mxu1 %v3505_v43  ;;  %3514 = vmatprep.subr.bf16.mxu0 %v3513_v44  ;;  %v2219_v43 = vld [vmem:[#allocation7 + $0xd0] sm:$0xff]  ;;  %v2220_v44 = vld [vmem:[#allocation7 + $0xd8] sm:$0xff] }
 0xc7d   : > { %2793 = vmatmul.mubr.msk.f32.gmra.mrb[10].mxu1 %vm648_vm9, %v1788_v54  ;;  %2795 = vmatmul.mubr.msk.f32.gmra.mrb[12].mxu0 %vm648_vm9, %v1788_v54 }
 0xc7e   : > { %3508 = vmatpush1.bf16.msra.mxu1 %v3507_v52  ;;  %3516 = vmatpush1.bf16.msra.mxu0 %v3515_v53  ;;  %v2204_v52 = vld [vmem:[#allocation7 + $0x58] sm:$0xff]  ;;  %v3537_v53 = vpack.c.bf16 %v2220_v44, %v2219_v43 }
 0xc7f   : > { %2087 = vmatprep.mubr.f32.mxu1 %v3851_v29  ;;  %2164 = vmatprep.mubr.f32.mxu0 %v3851_v29  ;;  %v3539_v60 = vpack.c.bf16 %v2204_v52, %v2203_v51 }
 0xc80   : > { %3518 = vmatprep.subr.bf16.mxu1 %v3517_v57  ;;  %3550 = vmatprep.subr.bf16.mxu0 %v3549_v48  ;;  %v2221_v57 = vld [vmem:[#allocation7 + $0xe0] sm:$0xff]  ;;  %v2222_v48 = vld [vmem:[#allocation7 + $0xe8] sm:$0xff] }
 0xc81   : > { %2796 = vmatmul.mubr.msk.f32.vlgmr.msra.gmra.mrb[12].mxu1 %vm648_vm9, %v1787_v39  ;;  %2798 = vmatmul.mubr.msk.f32.vlgmr.msra.gmra.mrb[14].mxu0 %vm648_vm9, %v1787_v39  ;;  %v3533_v39 = vpack.c.bf16 %v2218_v32, %v2217_v31  ;;  %v3541_v62 = vpack.c.bf16 %v2222_v48, %v2221_v57  ;;  %v2259_v57 = vld [vmem:[#allocation7 + $0x210] sm:$0xff] }
 0xc82   : > { %2093 = vmatprep.mubr.f32.mxu1 %v3851_v29  ;;  %2170 = vmatprep.mubr.f32.mxu0 %v3851_v29  ;;  %v2248_v29 = vld [vmem:[#allocation7 + $0x1b8] sm:$0xff] }
 0xc83   : > { %3520 = vmatpush3.bf16.msra.mxu1 %v3519_v63  ;;  %3552 = vmatpush3.bf16.msra.mxu0 %v3551_v0  ;;  %v3561_v27 = vpack.c.bf16 %v2248_v29, %v2247_v21  ;;  %v3573_v63 = vpack.c.bf16 %v2254_v59, %v2253_v58  ;;  %v2206_v0 = vld [vmem:[#allocation7 + $0x68] sm:$0xff] }
 0xc84   : > { %3522 = vmatprep.subr.bf16.mxu1 %v3521_v3  ;;  %3554 = vmatprep.subr.bf16.mxu0 %v3553_v4  ;;  %v3543_v3 = vpack.c.bf16 %v2206_v0, %v2205_v61  ;;  %v3575_v4 = vpack.c.bf16 %v2238_v2, %v2237_v1  ;;  %v2306_v21 = vld [vmem:[#allocation7 + $0x388] sm:$0xff] }
 0xc85   : > { %2797 = vmatmul.mubr.msk.f32.gmra.mrb[14].mxu1 %vm648_vm9, %v1788_v54  ;;  %2799 = vmatmul.mubr.msk.f32.gmra.mrb[16].mxu0 %vm648_vm9, %v1788_v54  ;;  %v3569_v54 = vpack.c.bf16 %v2252_v47, %v2251_v45  ;;  %v3613_v29 = vpack.c.bf16 %v2306_v21, %v2305_v19  ;;  %v2276_v47 = vld [vmem:[#allocation7 + $0x298] sm:$0xff]  ;;  %v2262_v21 = vld [vmem:[#allocation7 + $0x228] sm:$0xff] }
 0xc87   : > { %3524 = vmatpush3.bf16.msra.mxu1 %v3523_v11  ;;  %3556 = vmatpush3.bf16.msra.mxu0 %v3555_v12  ;;  %v2208_v11 = vld [vmem:[#allocation7 + $0x78] sm:$0xff]  ;;  %v3577_v12 = vpack.c.bf16 %v2256_v9, %v2255_v7  ;;  %v2277_v7 = vld [vmem:[#allocation7 + $0x2a0] sm:$0xff] }
 0xc88   : > { %3526 = vmatprep.subr.bf16.mxu1 %v3525_v15  ;;  %3558 = vmatprep.subr.bf16.mxu0 %v3557_v16  ;;  %v3547_v13 = vpack.c.bf16 %v2208_v11, %v2207_v10  ;;  %v2240_v15 = vld [vmem:[#allocation7 + $0x178] sm:$0xff]  ;;  %v2278_v11 = vld [vmem:[#allocation7 + $0x2a8] sm:$0xff] }
 0xc89   : > { %v3579_v16 = vpack.c.bf16 %v2240_v15, %v2239_v14  ;;  %v2261_v14 = vld [vmem:[#allocation7 + $0x220] sm:$0xff] }
 0xc8b   : > { %3528 = vmatpush3.bf16.msra.mxu1 %v3527_v22  ;;  %3560 = vmatpush3.bf16.msra.mxu0 %v3559_v23  ;;  %v1823_v22 = vlaneseq }
 0xc8c   : > { %3530 = vmatprep.subr.bf16.mxu1 %v3529_v26  ;;  %3562 = vmatprep.subr.bf16.mxu0 %v3561_v27  ;;  %v4281_v26 = vld [vmem:[%s4344_s10] sm:$0xff] }
 0xc8d   : > { %v4274_v23 = vshrl.u32 %v1823_v22, 7 }
 0xc8f   : > { %3532 = vmatpush3.bf16.msra.mxu1 %v3531_v35  ;;  %3564 = vmatpush3.bf16.msra.mxu0 %v3563_v36  ;;  %v1825_v24 = vsub.s32 0, %v4274_v23  ;;  %v1833_v25 = vsub.s32 2, %v4274_v23  ;;  %v1829_v27 = vsub.s32 1, %v4274_v23  ;;  %v1837_v28 = vsub.s32 3, %v4274_v23  ;;  %v2258_v35 = vld [vmem:[#allocation7 + $0x208] sm:$0xff] }
 0xc90   : > { %3534 = vmatprep.subr.bf16.mxu1 %v3533_v39  ;;  %3566 = vmatprep.subr.bf16.mxu0 %v3565_v40  ;;  %v1845_v36 = vsub.s32 5, %v4274_v23  ;;  %v2289_v39 = vld [vmem:[#allocation7 + $0x300] sm:$0xff]  ;;  %v2290_v40 = vld [vmem:[#allocation7 + $0x308] sm:$0xff] }
 0xc91   : > { %v1826_v30 = vrot.slane %v4281_v26, %v1825_v24  ;;  %v1834_v31 = vrot.slane %v4281_v26, %v1833_v25  ;;  %v1830_v32 = vrot.slane %v4281_v26, %v1829_v27  ;;  %v1838_v33 = vrot.slane %v4281_v26, %v1837_v28 }
 0xc92   : > { %v3615_v55 = vpack.c.bf16 %v2290_v40, %v2289_v39  ;;  %v4292_v56 = vrot.slane %v4281_v26, %v1845_v36  ;;  %v3589_v28 = vpack.c.bf16 %v2278_v11, %v2277_v7  ;;  %v2311_v36 = vld [vmem:[#allocation7 + $0x3b0] sm:$0xff] }
 0xc93   : > { %3536 = vmatpush3.bf16.msra.mxu1 %v3535_v49  ;;  %3568 = vmatpush3.bf16.msra.mxu0 %v3567_v50  ;;  %v2307_v49 = vld [vmem:[#allocation7 + $0x390] sm:$0xff]  ;;  %v2308_v50 = vld [vmem:[#allocation7 + $0x398] sm:$0xff] }
 0xc94   : > { %3538 = vmatprep.subr.bf16.mxu1 %v3537_v53  ;;  %3570 = vmatprep.subr.bf16.mxu0 %v3569_v54  ;;  %v1853_v53 = vsub.s32 7, %v4274_v23  ;;  %v3583_v54 = vpack.c.bf16 %v2258_v35, %v2257_v34  ;;  %v3617_v61 = vpack.c.bf16 %v2308_v50, %v2307_v49  ;;  %v2280_v35 = vld [vmem:[#allocation7 + $0x2b8] sm:$0xff]  ;;  %v2267_v7 = vld [vmem:[#allocation7 + $0x250] sm:$0xff] }
 0xc96   : > { %v4295_v10 = vrot.slane %v4281_v26, %v1853_v53  ;;  %v2296_v53 = vld [vmem:[#allocation7 + $0x338] sm:$0xff] }
 0xc97   : > { %3540 = vmatpush3.bf16.msra.mxu1 %v3539_v60  ;;  %3572 = vmatpush3.bf16.msra.mxu0 %v3571_v46  ;;  %v3585_v46 = vpack.c.bf16 %v2276_v47, %v2275_v41 }
 0xc98   : > { %3542 = vmatprep.subr.bf16.mxu1 %v3541_v62  ;;  %3574 = vmatprep.subr.bf16.mxu0 %v3573_v63  ;;  %v2260_v62 = vld [vmem:[#allocation7 + $0x218] sm:$0xff]  ;;  %v2291_v63 = vld [vmem:[#allocation7 + $0x310] sm:$0xff] }
 0xc99   : > { %v3587_v19 = vpack.c.bf16 %v2260_v62, %v2259_v57  ;;  %v2313_v57 = vld [vmem:[#allocation7 + $0x3c0] sm:$0xff] }
 0xc9b   : > { %3544 = vmatpush3.bf16.msra.mxu1 %v3543_v3  ;;  %3576 = vmatpush3.bf16.msra.mxu0 %v3575_v4 }
 0xc9c   : > { %3546 = vmatprep.subr.bf16.mxu1 %v3545_v8  ;;  %3578 = vmatprep.subr.bf16.mxu0 %v3577_v12  ;;  %v2309_v12 = vld [vmem:[#allocation7 + $0x3a0] sm:$0xff] }
 0xc9f   : > { %3548 = vmatpush3.bf16.msra.mxu1 %v3547_v13  ;;  %3580 = vmatpush3.bf16.msra.mxu0 %v3579_v16  ;;  %v2310_v13 = vld [vmem:[#allocation7 + $0x3a8] sm:$0xff] }
 0xca0   : > { %3582 = vmatprep.subr.bf16.mxu1 %v3581_v20  ;;  %3614 = vmatprep.subr.bf16.mxu0 %v3613_v29  ;;  %v3619_v20 = vpack.c.bf16 %v2292_v6, %v2291_v63  ;;  %v2293_v29 = vld [vmem:[#allocation7 + $0x320] sm:$0xff] }
 0xca1   : > { %v2297_v63 = vld [vmem:[#allocation7 + $0x340] sm:$0xff] }
 0xd4c   : > { %v1935_v37 = vpop.f32.mrb[8].mxu1  ;;  %v2012_v38 = vpop.f32.mrb[10].mxu0 }
 0xd4d   : > { %v1936_v42 = vadd.f32 %v1935_v37, %v1826_v30  ;;  %v2013_v43 = vadd.f32 %v2012_v38, %v1834_v31  ;;  %v1937_v44 = vpop.f32.mrb[9].mxu1  ;;  %v2014_v45 = vpop.f32.mrb[11].mxu0  ;;  %v2312_v37 = vld [vmem:[#allocation7 + $0x3b8] sm:$0xff] }
 0xd4e   : > { %v1938_v51 = vadd.f32 %v1937_v44, %v1830_v32  ;;  %v2015_v52 = vadd.f32 %v2014_v45, %v1838_v33  ;;  %v2263_v44 = vld [vmem:[#allocation7 + $0x230] sm:$0xff]  ;;  %v2264_v45 = vld [vmem:[#allocation7 + $0x238] sm:$0xff] }
 0xd4f   : > { %v2177_v0 = vmax.f32 %v1936_v42, 0.0  ;;  %v2179_v1 = vmax.f32 %v2013_v43, 0.0  ;;  %v3591_v42 = vpack.c.bf16 %v2262_v21, %v2261_v14  ;;  %v2285_v14 = vld [vmem:[#allocation7 + $0x2e0] sm:$0xff] }
 0xd50   : > { %v2178_v48 = vmax.f32 %v1938_v51, 0.0  ;;  %v2180_v58 = vmax.f32 %v2015_v52, 0.0  ;;  %v1941_v59 = vpop.f32.mrb[10].mxu1  ;;  %v2018_v60 = vpop.f32.mrb[12].mxu0  ;;  %v3625_v51 = vpack.c.bf16 %v2312_v37, %v2311_v36  ;;  %v2295_v52 = vld [vmem:[#allocation7 + $0x330] sm:$0xff] }
 0xd51   : > { %v1942_v2 = vadd.f32 %v1941_v59, %v1826_v30  ;;  %v2019_v3 = vadd.f32 %v2018_v60, %v1834_v31  ;;  %v1943_v4 = vpop.f32.mrb[11].mxu1  ;;  %v2020_v5 = vpop.f32.mrb[13].mxu0  ;;  %v3621_v30 = vpack.c.bf16 %v2310_v13, %v2309_v12  ;;  %v2294_v31 = vld [vmem:[#allocation7 + $0x328] sm:$0xff]  ;;  %v3627_v59 = vpack.c.bf16 %v2296_v53, %v2295_v52  ;;  %v2265_v60 = vld [vmem:[#allocation7 + $0x240] sm:$0xff]  ;;  %v2299_v12 = vld [vmem:[#allocation7 + $0x350] sm:$0xff] }
 0xd52   : > { %v1944_v8 = vadd.f32 %v1943_v4, %v1830_v32  ;;  %v2021_v9 = vadd.f32 %v2020_v5, %v1838_v33  ;;  %2392 = vmatprep.mubr.f32.mxu1 %v2178_v48  ;;  %2467 = vmatprep.mubr.f32.mxu0 %v2180_v58  ;;  %v2279_v32 = vld [vmem:[#allocation7 + $0x2b0] sm:$0xff]  ;;  %v3623_v43 = vpack.c.bf16 %v2294_v31, %v2293_v29  ;;  %v2314_v48 = vld [vmem:[#allocation7 + $0x3c8] sm:$0xff]  ;;  %v2316_v4 = vld [vmem:[#allocation7 + $0x3d8] sm:$0xff] }
 0xd53   : > { %2393 = vmatmul.mubr.f32.vlgmr.msra.gmra.mrb[16].mxu1 %v2177_v0  ;;  %2468 = vmatmul.mubr.f32.vlgmr.msra.gmra.mrb[18].mxu0 %v2179_v1  ;;  %v2185_v22 = vmax.f32 %v1942_v2, 0.0  ;;  %v2187_v24 = vmax.f32 %v2019_v3, 0.0  ;;  %v3593_v50 = vpack.c.bf16 %v2280_v35, %v2279_v32  ;;  %v3595_v58 = vpack.c.bf16 %v2264_v45, %v2263_v44  ;;  %v2298_v0 = vld [vmem:[#allocation7 + $0x348] sm:$0xff]  ;;  %v2283_v1 = vld [vmem:[#allocation7 + $0x2d0] sm:$0xff]  ;;  %v2284_v2 = vld [vmem:[#allocation7 + $0x2d8] sm:$0xff] }
 0xd54   : > { %v2186_v15 = vmax.f32 %v1944_v8, 0.0  ;;  %v2188_v16 = vmax.f32 %v2021_v9, 0.0  ;;  %3584 = vmatpush3.bf16.msra.mxu1 %v3583_v54  ;;  %3616 = vmatpush3.bf16.msra.mxu0 %v3615_v55  ;;  %v4297_v17 = vpop.f32.mrb[12].mxu1  ;;  %v4299_v18 = vpop.f32.mrb[14].mxu0  ;;  %v2281_v54 = vld [vmem:[#allocation7 + $0x2c0] sm:$0xff]  ;;  %v2282_v55 = vld [vmem:[#allocation7 + $0x2c8] sm:$0xff]  ;;  %v3629_v62 = vpack.c.bf16 %v2314_v48, %v2313_v57  ;;  %v3631_v6 = vpack.c.bf16 %v2298_v0, %v2297_v63 }
 0xd55   : > { %v2091_v25 = vpop.f32.mrb[13].mxu1  ;;  %v2168_v27 = vpop.f32.mrb[15].mxu0  ;;  %3586 = vmatprep.subr.bf16.mxu1 %v3585_v46  ;;  %3618 = vmatprep.subr.bf16.mxu0 %v3617_v61  ;;  %v2266_v46 = vld [vmem:[#allocation7 + $0x248] sm:$0xff]  ;;  %v3597_v61 = vpack.c.bf16 %v2282_v55, %v2281_v54  ;;  %v2315_v3 = vld [vmem:[#allocation7 + $0x3d0] sm:$0xff]  ;;  %v2268_v8 = vld [vmem:[#allocation7 + $0x258] sm:$0xff]  ;;  %v3601_v9 = vpack.c.bf16 %v2284_v2, %v2283_v1 }
 0xd56   : > { %v2092_v33 = vadd.f32 %v2091_v25, %v4292_v56  ;;  %v2169_v34 = vadd.f32 %v2168_v27, %v4295_v10  ;;  %2397 = vmatprep.mubr.f32.mxu1 %v2186_v15  ;;  %2472 = vmatprep.mubr.f32.mxu0 %v2188_v16  ;;  %v3599_v5 = vpack.c.bf16 %v2266_v46, %v2265_v60  ;;  %v2300_v13 = vld [vmem:[#allocation7 + $0x358] sm:$0xff]  ;;  %v2286_v15 = vld [vmem:[#allocation7 + $0x2e8] sm:$0xff]  ;;  %v2317_v16 = vld [vmem:[#allocation7 + $0x3e0] sm:$0xff]  ;;  %v1849_v25 = vsub.s32 6, %v4274_v23 }
 0xd57   : > { %2398 = vmatmul.mubr.f32.gmra.mrb[18].mxu1 %v2185_v22  ;;  %2473 = vmatmul.mubr.f32.gmra.mrb[20].mxu0 %v2187_v24  ;;  %v3633_v11 = vpack.c.bf16 %v2316_v4, %v2315_v3  ;;  %v3603_v21 = vpack.c.bf16 %v2268_v8, %v2267_v7  ;;  %v3635_v29 = vpack.c.bf16 %v2300_v13, %v2299_v12  ;;  %v2269_v22 = vld [vmem:[#allocation7 + $0x260] sm:$0xff]  ;;  %v2270_v24 = vld [vmem:[#allocation7 + $0x268] sm:$0xff]  ;;  %v2287_v32 = vld [vmem:[#allocation7 + $0x2f0] sm:$0xff] }
 0xd58   : > { %v2182_v38 = vmax.f32 %v2092_v33, 0.0  ;;  %v2184_v39 = vmax.f32 %v2169_v34, 0.0  ;;  %3588 = vmatpush3.bf16.msra.mxu1 %v3587_v19  ;;  %3620 = vmatpush3.bf16.msra.mxu0 %v3619_v20  ;;  %v4303_v40 = vpop.f32.mrb[14].mxu1  ;;  %v4305_v41 = vpop.f32.mrb[16].mxu0  ;;  %v2318_v19 = vld [vmem:[#allocation7 + $0x3e8] sm:$0xff]  ;;  %v1841_v20 = vsub.s32 4, %v4274_v23  ;;  %v3605_v27 = vpack.c.bf16 %v2286_v15, %v2285_v14 }
 0xd59   : > { %v4307_v47 = vpop.f32.mrb[15].mxu1  ;;  %v4309_v49 = vpop.f32.mrb[17].mxu0  ;;  %3590 = vmatprep.subr.bf16.mxu1 %v3589_v28  ;;  %3622 = vmatprep.subr.bf16.mxu0 %v3621_v30  ;;  %v3637_v28 = vpack.c.bf16 %v2318_v19, %v2317_v16  ;;  %v2301_v30 = vld [vmem:[#allocation7 + $0x360] sm:$0xff]  ;;  %v2302_v31 = vld [vmem:[#allocation7 + $0x368] sm:$0xff]  ;;  %v2288_v33 = vld [vmem:[#allocation7 + $0x2f8] sm:$0xff]  ;;  %v3607_v37 = vpack.c.bf16 %v2270_v24, %v2269_v22 }
 0xd5a   : > { %2542 = vmatprep.mubr.f32.mxu1 %v2182_v38  ;;  %2617 = vmatprep.mubr.f32.mxu0 %v2184_v39  ;;  %v2319_v34 = vld [vmem:[#allocation7 + $0x3f0] sm:$0xff]  ;;  %v2320_v35 = vld [vmem:[#allocation7 + $0x3f8] sm:$0xff]  ;;  %v1842_v36 = vrot.slane %v4281_v26, %v1841_v20  ;;  %v3639_v38 = vpack.c.bf16 %v2302_v31, %v2301_v30  ;;  %v3609_v23 = vpack.c.bf16 %v2288_v33, %v2287_v32 }
 0xd5b   : > { %v2271_v39 = vld [vmem:[#allocation7 + $0x270] sm:$0xff]  ;;  %v2272_v44 = vld [vmem:[#allocation7 + $0x278] sm:$0xff]  ;;  %v2175_v55 = vadd.f32 %v4309_v49, %v4295_v10 }
 0xd5c   : > { %3592 = vmatpush3.bf16.msra.mxu1 %v3591_v42  ;;  %3624 = vmatpush3.bf16.msra.mxu0 %v3623_v43  ;;  %v1850_v42 = vrot.slane %v4281_v26, %v1849_v25  ;;  %v3641_v43 = vpack.c.bf16 %v2320_v35, %v2319_v34  ;;  %v2303_v45 = vld [vmem:[#allocation7 + $0x370] sm:$0xff]  ;;  %v2090_v53 = vadd.f32 %v4297_v17, %v1842_v36 }
 0xd5d   : > { %3594 = vmatprep.subr.bf16.mxu1 %v3593_v50  ;;  %3626 = vmatprep.subr.bf16.mxu0 %v3625_v51  ;;  %v2304_v50 = vld [vmem:[#allocation7 + $0x378] sm:$0xff]  ;;  %v3611_v51 = vpack.c.bf16 %v2272_v44, %v2271_v39  ;;  %v2098_v26 = vadd.f32 %v4307_v47, %v4292_v56  ;;  %v2192_v17 = vmax.f32 %v2175_v55, 0.0  ;;  %v2800_v47 = vld [vmem:[%s4346_s12] ss:$0 sm:$0xff] }
 0xd5e   : > { %v3643_v52 = vpack.c.bf16 %v2304_v50, %v2303_v45  ;;  %v2167_v54 = vadd.f32 %v4299_v18, %v1850_v42  ;;  %v2181_v57 = vmax.f32 %v2090_v53, 0.0 }
 0xd5f   : > { %v2190_v60 = vmax.f32 %v2098_v26, 0.0 }
 0xd60   : > { %3596 = vmatpush3.bf16.msra.mxu1 %v3595_v58  ;;  %3628 = vmatpush3.bf16.msra.mxu0 %v3627_v59  ;;  %v2183_v48 = vmax.f32 %v2167_v54, 0.0  ;;  %v2096_v58 = vadd.f32 %v4303_v40, %v1842_v36  ;;  %v2173_v59 = vadd.f32 %v4305_v41, %v1850_v42 }
 0xd61   : > { %3598 = vmatprep.subr.bf16.mxu1 %v3597_v61  ;;  %3630 = vmatprep.subr.bf16.mxu0 %v3629_v62 }
 0xd62   : > { %v2189_v18 = vmax.f32 %v2096_v58, 0.0  ;;  %v2191_v46 = vmax.f32 %v2173_v59, 0.0 }
 0xd64   : > { %3600 = vmatpush3.bf16.msra.mxu1 %v3599_v5  ;;  %3632 = vmatpush3.bf16.msra.mxu0 %v3631_v6 }
 0xd65   : > { %3602 = vmatprep.subr.bf16.mxu1 %v3601_v9  ;;  %3634 = vmatprep.subr.bf16.mxu0 %v3633_v11 }
 0xd68   : > { %3604 = vmatpush3.bf16.msra.mxu1 %v3603_v21  ;;  %3636 = vmatpush3.bf16.msra.mxu0 %v3635_v29 }
 0xd69   : > { %3606 = vmatprep.subr.bf16.mxu1 %v3605_v27  ;;  %3638 = vmatprep.subr.bf16.mxu0 %v3637_v28 }
 0xd6c   : > { %3608 = vmatpush3.bf16.msra.mxu1 %v3607_v37  ;;  %3640 = vmatpush3.bf16.msra.mxu0 %v3639_v38 }
 0xd6d   : > { %3610 = vmatprep.subr.bf16.mxu1 %v3609_v23  ;;  %3642 = vmatprep.subr.bf16.mxu0 %v3641_v43 }
 0xd70   : > { %3612 = vmatpush3.bf16.msra.mxu1 %v3611_v51  ;;  %3644 = vmatpush3.bf16.msra.mxu0 %v3643_v52 }
 0xd73   : > { %2543 = vmatmul.mubr.f32.vlgmr.msra.gmra.mrb[20].mxu1 %v2181_v57  ;;  %2618 = vmatmul.mubr.f32.vlgmr.msra.gmra.mrb[22].mxu0 %v2183_v48 }
 0xd74   : > { %2547 = vmatprep.mubr.f32.mxu1 %v2190_v60  ;;  %2622 = vmatprep.mubr.f32.mxu0 %v2192_v17 }
 0xd77   : > { %2548 = vmatmul.mubr.f32.gmra.mrb[22].mxu1 %v2189_v18  ;;  %2623 = vmatmul.mubr.f32.gmra.mrb[24].mxu0 %v2191_v46 }
 0xe26   : > { %v2952_v56 = vpop.f32.mrb[16].mxu1  ;;  %v2990_v10 = vpop.f32.mrb[18].mxu0 }
 0xe27   : > { %v2953_v49 = vpop.f32.mrb[17].mxu1  ;;  %v2991_v40 = vpop.f32.mrb[19].mxu0 }
 0xe28   : > { %v2954_v61 = vadd.f32 %v2953_v49, %v2952_v56  ;;  %v2992_v41 = vadd.f32 %v2991_v40, %v2990_v10 }
 0xe2a   : > { %v2395_v62 = vadd.f32 %v2954_v61, %v2800_v47  ;;  %v2955_v63 = vpop.f32.mrb[18].mxu1  ;;  %v2993_v0 = vpop.f32.mrb[20].mxu0 }
 0xe2b   : > { %v2956_v1 = vpop.f32.mrb[19].mxu1  ;;  %v2994_v2 = vpop.f32.mrb[21].mxu0 }
 0xe2c   : > { %v2470_v3 = vadd.f32 %v2992_v41, %v2395_v62  ;;  %v2957_v4 = vadd.f32 %v2956_v1, %v2955_v63  ;;  %v2995_v5 = vadd.f32 %v2994_v2, %v2993_v0 }
 0xe2e   : > { %v2400_v6 = vadd.f32 %v2957_v4, %v2800_v47 }
 0xe30   : > { %v2475_v7 = vadd.f32 %v2995_v5, %v2400_v6 }
 0xe46   : > { %v3028_v8 = vpop.f32.mrb[20].mxu1  ;;  %v3066_v9 = vpop.f32.mrb[22].mxu0 }
 0xe47   : > { %v3029_v11 = vpop.f32.mrb[21].mxu1  ;;  %v3067_v12 = vpop.f32.mrb[23].mxu0 }
 0xe48   : > { %v3030_v13 = vadd.f32 %v3029_v11, %v3028_v8  ;;  %v3068_v14 = vadd.f32 %v3067_v12, %v3066_v9 }
 0xe4a   : > { %v2545_v15 = vadd.f32 %v3030_v13, %v2470_v3  ;;  %v3031_v16 = vpop.f32.mrb[22].mxu1  ;;  %v3069_v19 = vpop.f32.mrb[24].mxu0 }
 0xe4b   : > { %v3032_v20 = vpop.f32.mrb[23].mxu1  ;;  %v3070_v21 = vpop.f32.mrb[25].mxu0 }
 0xe4c   : > { %v2620_v29 = vadd.f32 %v3068_v14, %v2545_v15  ;;  %v3033_v22 = vadd.f32 %v3032_v20, %v3031_v16  ;;  %v3071_v24 = vadd.f32 %v3070_v21, %v3069_v19 }
 0xe4e   : > { %2629 = vst.msk [vmem:[%s499_s19] sm:$0xff] %vm2628_vm11, %v2620_v29  ;;  %v2550_v25 = vadd.f32 %v3033_v22, %v2475_v7 }
 0xe50   : > { %v2625_v27 = vadd.f32 %v3071_v24, %v2550_v25 }
 0xe52   : > { %2630 = vst.msk [vmem:[%s499_s19 + $0x8] sm:$0xff] %vm2628_vm11, %v2625_v27 }
 0xe53 PF: > { %s4368_s20 = sld [smem:[#allocation12_spill]] }
 0xe59   : > { %s26_s25 = sadd.s32 1, %s4368_s20  }
 0xe5a   : > { %p23_p6 = scmp.ge.s32.totalorder %s26_s25, 4  }
 0xe5c   :  { %25 = sbr.rel (!%p23_p6) target bundleno = 5 (0x5), region = 137 }
 0xe63   :  { %2652 = vsyncpa [#allocation3], 1 }
 0xe64   :  { %2654 = vsyncpa [#allocation3 + $0x1], 1 }
 0xe65   :  { %2655 = vsyncpa [#allocation5], 1 }
 0xe66   :  { %2656 = vsyncpa [#allocation8], 1 }

</bundles_post_ra>
